<compile_context>
chip_gen: v7x
topology: tpu7x:2x2x1
jax: 0.10.0
libtpu: 0.0.40
codegen_flags: <defaults>
</compile_context>

<pallas_src>
import math

import jax
import jax.numpy as jnp
from jax.experimental import pallas as pl
from jax.experimental.pallas import tpu as pltpu


def _round_up(x, m):
    return ((x + m - 1) // m) * m


def _m_tiling(m, tm_max):
    """Pick (tm, nblk, m_pad).

    tm is a multiple of 16 and, when the layer is split, an exact divisor of m
    with an even block count preferred, so that:
      * m_pad == m (no extra pad pass over the patch matrix, no tail compute),
      * the "parallel" grid splits evenly across v7x's two TensorCores,
      * small layers stay at nblk=1 (no per-step overhead on single-TC chips).
    """
    if m <= tm_max:
        tm = _round_up(m, 16)
        return tm, 1, tm
    nblk0 = pl.cdiv(m, tm_max)
    best = None
    for nblk in range(nblk0, min(nblk0 + 64, m) + 1):
        if m % nblk == 0 and (m // nblk) % 16 == 0:
            if nblk % 2 == 0:
                return m // nblk, nblk, m          # exact, even split
            if best is None:
                best = (m // nblk, nblk, m)        # exact, odd split
    if best is not None:
        return best
    # Fallback: pad M (rare — only when m has no usable divisors).
    nblk = _round_up(nblk0, 2)
    tm = _round_up(pl.cdiv(m, nblk), 16)
    nblk = pl.cdiv(m, tm)
    return tm, nblk, tm * nblk


def conv_mm_kernel(p_ref, w_ref, b_ref, o_ref):
    """One grid step: full im2col GEMM for one M-tile.

    p_ref: (tm, Kp)    im2col patch rows (bf16)
    w_ref: (Kp, Cout)  im2col weight matrix (bf16, shared by all tiles)
    b_ref: (1, Cout)   bias (f32)
    o_ref: (tm, Cout)  output tile (bf16 for hidden layers, f32 for the last)
    """
    acc = jnp.dot(p_ref[...], w_ref[...], preferred_element_type=jnp.float32)
    o_ref[...] = (acc + b_ref[...]).astype(o_ref.dtype)


def conv2d_pallas(x_nhwc, w, b, stride, *, out_dtype=jnp.bfloat16,
                  compute_dtype=jnp.bfloat16, tm_max=1024):
    """VALID 2-D convolution as one fused im2col GEMM.

    x_nhwc: (N, H, W, Cin_x) — may carry extra trailing channels from a
            previous layer (they are sliced off, never multiplied).
    w:      (Cout, Cin, K, K)  (PyTorch OIHW layout)
    b:      (Cout,)
    Returns (N, OH, OW, Cout) in `out_dtype`.
    """
    cout, cin_w, k, _ = w.shape
    n, h, wd, cin_x = x_nhwc.shape
    if cin_x > cin_w:
        # Drop padded/extra input channels instead of zero-padding the weights
        # (avoids multiplying exact zeros and 3x-larger patch DMA).
        x_nhwc = x_nhwc[..., :cin_w]
    cin = cin_w
    oh = (h - k) // stride + 1
    ow = (wd - k) // stride + 1
    m = n * oh * ow
    kdim = k * k * cin
    kdim_p = _round_up(kdim, 128)

    x_nhwc = x_nhwc.astype(compute_dtype)

    # ---- im2col glue (pure data movement, no FLOPs) -----------------------
    # A single bf16 concatenate builds the patch matrix with the K padding
    # folded in -> one HBM materialization pass.  Column order is (kh, kw, cin),
    # matching the weight matrix below.
    cols = []
    for kh in range(k):
        for kw in range(k):
            win = x_nhwc[:,
                         kh:kh + stride * (oh - 1) + 1:stride,
                         kw:kw + stride * (ow - 1) + 1:stride,
                         :]
            cols.append(win.reshape(m, cin))
    if kdim_p != kdim:
        cols.append(jnp.zeros((m, kdim_p - kdim), compute_dtype))
    patches = jnp.concatenate(cols, axis=1)            # (m, kdim_p), bf16

    tm, nblk, m_pad = _m_tiling(m, tm_max)
    if m_pad != m:                                     # rare fallback path
        patches = jnp.pad(patches, ((0, m_pad - m), (0, 0)))

    # Weights -> (kh, kw, cin, cout) -> (K, Cout), matching the patch layout.
    wmat = jnp.transpose(w, (2, 3, 1, 0)).reshape(kdim, cout)
    if kdim_p != kdim:
        wmat = jnp.pad(wmat, ((0, kdim_p - kdim), (0, 0)))
    wmat = wmat.astype(compute_dtype)
    bias = b.reshape(1, cout).astype(jnp.float32)

    out = pl.pallas_call(
        conv_mm_kernel,
        out_shape=jax.ShapeDtypeStruct((m_pad, cout), out_dtype),
        grid=(nblk,),
        in_specs=[
            pl.BlockSpec((tm, kdim_p), lambda i: (i, 0)),
            pl.BlockSpec((kdim_p, cout), lambda i: (0, 0)),
            pl.BlockSpec((1, cout), lambda i: (0, 0)),
        ],
        out_specs=pl.BlockSpec((tm, cout), lambda i: (i, 0)),
        compiler_params=pltpu.CompilerParams(
            dimension_semantics=("parallel",),
        ),
    )(patches, wmat, bias)

    if m_pad != m:
        out = out[:m]
    return out.reshape(n, oh, ow, cout)


def convnet_forward(x, params, batch_size, patches, frames, patch_size):
    """Pallas implementation of ConvNet.forward."""
    n = batch_size * frames * patches
    x = x.reshape(n, 3, patch_size, patch_size)              # NCHW, as PyTorch
    x = jnp.transpose(x, (0, 2, 3, 1)).astype(jnp.bfloat16)  # NHWC, cast once
    (w1, b1), (w2, b2), (w3, b3) = params
    x = conv2d_pallas(x, w1, b1, stride=1, out_dtype=jnp.bfloat16)  # (N,24,24, 32)
    x = conv2d_pallas(x, w2, b2, stride=3, out_dtype=jnp.bfloat16)  # (N, 8, 8,128)
    x = conv2d_pallas(x, w3, b3, stride=3, out_dtype=jnp.float32)   # (N, 2, 2,256)
    # TODO(synk): nn.Dropout / nn.ReLU exist in __init__ but are never applied
    # in forward(), so they are intentionally omitted.
    # PyTorch flatten(start_dim=1) runs over NCHW -> restore C-major ordering.
    x = jnp.transpose(x, (0, 3, 1, 2)).reshape(n, 256 * 2 * 2)
    return x.reshape(batch_size, frames, patches, 1024)


def ref_forward(x, params, batch_size, patches, frames, patch_size):
    """Pure-JAX reference (lax.conv, NCHW, f32) mirroring the PyTorch forward."""
    n = batch_size * frames * patches
    x = x.reshape(n, 3, patch_size, patch_size)
    for (w, b), s in zip(params, (1, 3, 3)):
        x = jax.lax.conv_general_dilated(
            x, w, window_strides=(s, s), padding="VALID",
            dimension_numbers=("NCHW", "OIHW", "NCHW"),
        ) + b[None, :, None, None]
    x = x.reshape(n, -1)
    return x.reshape(batch_size, frames, patches, 1024)


def init_conv(key, cout, cin, k):
    """Deterministic init mimicking PyTorch Conv2d defaults (uniform +-1/sqrt(fan_in))."""
    fan_in = cin * k * k
    bound = 1.0 / math.sqrt(fan_in)
    kw, kb = jax.random.split(key)
    w = jax.random.uniform(kw, (cout, cin, k, k), jnp.float32, -bound, bound)
    b = jax.random.uniform(kb, (cout,), jnp.float32, -bound, bound)
    return w, b


if __name__ == "__main__":
    batch_size, patches, frames, patch_size = 2, 2, 2, 28  # ps=28 => 2x2x256=1024 feats

    key = jax.random.PRNGKey(0)
    kx, k1, k2, k3 = jax.random.split(key, 4)
    x = jax.random.normal(
        kx, (batch_size, frames, patches, 3, patch_size, patch_size), jnp.float32
    )
    params = [
        init_conv(k1, 32, 3, 5),
        init_conv(k2, 128, 32, 3),
        init_conv(k3, 256, 128, 3),
    ]

    fwd = jax.jit(
        lambda xin: convnet_forward(
            xin, params, batch_size, patches, frames, patch_size
        )
    )
    out = jax.block_until_ready(fwd(x))
    assert out.shape == (batch_size, frames, patches, 1024), out.shape

    ref = ref_forward(x, params, batch_size, patches, frames, patch_size)
    rel_err = float(
        jnp.max(jnp.abs(out.astype(jnp.float32) - ref))
        / (jnp.max(jnp.abs(ref)) + 1e-6)
    )
    # bf16 patches/weights + bf16 hidden activations (f32 accumulation).
    assert rel_err < 3e-2, f"mismatch vs lax.conv reference: rel_err={rel_err}"

    print("KERNEL_OK")
</pallas_src>

<mosaic_0001>
module attributes {stable_mosaic.version = 11 : i64} {
  func.func @conv_mm_kernel(%arg0: i32, %arg1: memref<768x128xbf16, #tpu.memory_space<vmem>>, %arg2: memref<128x32xbf16, #tpu.memory_space<vmem>>, %arg3: memref<1x32xf32, #tpu.memory_space<vmem>>, %arg4: memref<768x32xbf16, #tpu.memory_space<vmem>>) attributes {dimension_semantics = [#tpu.dimension_semantics<parallel>], iteration_bounds = array<i64: 6>, scalar_prefetch = 0 : i64, scratch_operands = 0 : i64, tpu.core_type = #tpu.core_type<tc>, window_params = [{transform_indices = @transform_0, window_bounds = array<i64: 768, 128>}, {pipeline_mode = #tpu.pipeline_mode<synchronous>, transform_indices = @transform_1, window_bounds = array<i64: 128, 32>}, {pipeline_mode = #tpu.pipeline_mode<synchronous>, transform_indices = @transform_2, window_bounds = array<i64: 1, 32>}, {transform_indices = @transform_3, window_bounds = array<i64: 768, 32>}]} {
    %c0 = arith.constant 0 : index
    %c0_0 = arith.constant 0 : index
    %0 = vector.load %arg1[%c0, %c0_0] : memref<768x128xbf16, #tpu.memory_space<vmem>>, vector<768x128xbf16>
    %c0_1 = arith.constant 0 : index
    %c0_2 = arith.constant 0 : index
    %1 = vector.load %arg2[%c0_1, %c0_2] : memref<128x32xbf16, #tpu.memory_space<vmem>>, vector<128x32xbf16>
    %cst = arith.constant dense<0.000000e+00> : vector<768x32xf32>
    %2 = tpu.matmul %0, %1, %cst {dimension_numbers = #tpu.dot_dimension_numbers<[1], [0], [0], [1], [0, 0, 1, 1], [], []>} : vector<768x128xbf16>, vector<128x32xbf16>, vector<768x32xf32> -> vector<768x32xf32>
    %c0_3 = arith.constant 0 : index
    %c0_4 = arith.constant 0 : index
    %3 = vector.load %arg3[%c0_3, %c0_4] : memref<1x32xf32, #tpu.memory_space<vmem>>, vector<1x32xf32>
    %4 = vector.broadcast %3 : vector<1x32xf32> to vector<768x32xf32>
    %5 = arith.addf %2, %4 : vector<768x32xf32>
    %6 = arith.truncf %5 : vector<768x32xf32> to vector<768x32xbf16>
    %c0_5 = arith.constant 0 : index
    %c0_6 = arith.constant 0 : index
    %7 = vector.load %arg4[%c0_5, %c0_6] : memref<768x32xbf16, #tpu.memory_space<vmem>>, vector<768x32xbf16>
    tpu.vector_store %arg4[%c0_5, %c0_6], %6 {strides = array<i32>} : memref<768x32xbf16, #tpu.memory_space<vmem>>, vector<768x32xbf16>,
    return
  }
  func.func @transform_0(%arg0: i32) -> (i32, i32) {
    %c0_i32 = arith.constant 0 : i32
    %c0_i32_0 = arith.constant 0 : i32
    return %arg0, %c0_i32 : i32, i32
  }
  func.func @transform_1(%arg0: i32) -> (i32, i32) {
    %c0_i32 = arith.constant 0 : i32
    %c0_i32_0 = arith.constant 0 : i32
    %c0_i32_1 = arith.constant 0 : i32
    return %c0_i32, %c0_i32_0 : i32, i32
  }
  func.func @transform_2(%arg0: i32) -> (i32, i32) {
    %c0_i32 = arith.constant 0 : i32
    %c0_i32_0 = arith.constant 0 : i32
    %c0_i32_1 = arith.constant 0 : i32
    return %c0_i32, %c0_i32_0 : i32, i32
  }
  func.func @transform_3(%arg0: i32) -> (i32, i32) {
    %c0_i32 = arith.constant 0 : i32
    %c0_i32_0 = arith.constant 0 : i32
    return %arg0, %c0_i32 : i32, i32
  }
}

module attributes {stable_mosaic.version = 11 : i64} {
  func.func @conv_mm_kernel(%arg0: i32, %arg1: memref<512x384xbf16, #tpu.memory_space<vmem>>, %arg2: memref<384x128xbf16, #tpu.memory_space<vmem>>, %arg3: memref<1x128xf32, #tpu.memory_space<vmem>>, %arg4: memref<512x128xbf16, #tpu.memory_space<vmem>>) attributes {dimension_semantics = [#tpu.dimension_semantics<parallel>], iteration_bounds = array<i64: 1>, scalar_prefetch = 0 : i64, scratch_operands = 0 : i64, tpu.core_type = #tpu.core_type<tc>, window_params = [{transform_indices = @transform_0, window_bounds = array<i64: 512, 384>}, {pipeline_mode = #tpu.pipeline_mode<synchronous>, transform_indices = @transform_1, window_bounds = array<i64: 384, 128>}, {pipeline_mode = #tpu.pipeline_mode<synchronous>, transform_indices = @transform_2, window_bounds = array<i64: 1, 128>}, {transform_indices = @transform_3, window_bounds = array<i64: 512, 128>}]} {
    %c0 = arith.constant 0 : index
    %c0_0 = arith.constant 0 : index
    %0 = vector.load %arg1[%c0, %c0_0] : memref<512x384xbf16, #tpu.memory_space<vmem>>, vector<512x384xbf16>
    %c0_1 = arith.constant 0 : index
    %c0_2 = arith.constant 0 : index
    %1 = vector.load %arg2[%c0_1, %c0_2] : memref<384x128xbf16, #tpu.memory_space<vmem>>, vector<384x128xbf16>
    %cst = arith.constant dense<0.000000e+00> : vector<512x128xf32>
    %2 = tpu.matmul %0, %1, %cst {dimension_numbers = #tpu.dot_dimension_numbers<[1], [0], [0], [1], [0, 0, 1, 1], [], []>} : vector<512x384xbf16>, vector<384x128xbf16>, vector<512x128xf32> -> vector<512x128xf32>
    %c0_3 = arith.constant 0 : index
    %c0_4 = arith.constant 0 : index
    %3 = vector.load %arg3[%c0_3, %c0_4] : memref<1x128xf32, #tpu.memory_space<vmem>>, vector<1x128xf32>
    %4 = vector.broadcast %3 : vector<1x128xf32> to vector<512x128xf32>
    %5 = arith.addf %2, %4 : vector<512x128xf32>
    %6 = arith.truncf %5 : vector<512x128xf32> to vector<512x128xbf16>
    %c0_5 = arith.constant 0 : index
    %c0_6 = arith.constant 0 : index
    %7 = vector.load %arg4[%c0_5, %c0_6] : memref<512x128xbf16, #tpu.memory_space<vmem>>, vector<512x128xbf16>
    tpu.vector_store %arg4[%c0_5, %c0_6], %6 {strides = array<i32>} : memref<512x128xbf16, #tpu.memory_space<vmem>>, vector<512x128xbf16>,
    return
  }
  func.func @transform_0(%arg0: i32) -> (i32, i32) {
    %c0_i32 = arith.constant 0 : i32
    %c0_i32_0 = arith.constant 0 : i32
    return %arg0, %c0_i32 : i32, i32
  }
  func.func @transform_1(%arg0: i32) -> (i32, i32) {
    %c0_i32 = arith.constant 0 : i32
    %c0_i32_0 = arith.constant 0 : i32
    %c0_i32_1 = arith.constant 0 : i32
    return %c0_i32, %c0_i32_0 : i32, i32
  }
  func.func @transform_2(%arg0: i32) -> (i32, i32) {
    %c0_i32 = arith.constant 0 : i32
    %c0_i32_0 = arith.constant 0 : i32
    %c0_i32_1 = arith.constant 0 : i32
    return %c0_i32, %c0_i32_0 : i32, i32
  }
  func.func @transform_3(%arg0: i32) -> (i32, i32) {
    %c0_i32 = arith.constant 0 : i32
    %c0_i32_0 = arith.constant 0 : i32
    return %arg0, %c0_i32 : i32, i32
  }
}

module attributes {stable_mosaic.version = 11 : i64} {
  func.func @conv_mm_kernel(%arg0: i32, %arg1: memref<32x1152xbf16, #tpu.memory_space<vmem>>, %arg2: memref<1152x256xbf16, #tpu.memory_space<vmem>>, %arg3: memref<1x256xf32, #tpu.memory_space<vmem>>, %arg4: memref<32x256xf32, #tpu.memory_space<vmem>>) attributes {dimension_semantics = [#tpu.dimension_semantics<parallel>], iteration_bounds = array<i64: 1>, scalar_prefetch = 0 : i64, scratch_operands = 0 : i64, tpu.core_type = #tpu.core_type<tc>, window_params = [{transform_indices = @transform_0, window_bounds = array<i64: 32, 1152>}, {pipeline_mode = #tpu.pipeline_mode<synchronous>, transform_indices = @transform_1, window_bounds = array<i64: 1152, 256>}, {pipeline_mode = #tpu.pipeline_mode<synchronous>, transform_indices = @transform_2, window_bounds = array<i64: 1, 256>}, {transform_indices = @transform_3, window_bounds = array<i64: 32, 256>}]} {
    %c0 = arith.constant 0 : index
    %c0_0 = arith.constant 0 : index
    %0 = vector.load %arg1[%c0, %c0_0] : memref<32x1152xbf16, #tpu.memory_space<vmem>>, vector<32x1152xbf16>
    %c0_1 = arith.constant 0 : index
    %c0_2 = arith.constant 0 : index
    %1 = vector.load %arg2[%c0_1, %c0_2] : memref<1152x256xbf16, #tpu.memory_space<vmem>>, vector<1152x256xbf16>
    %cst = arith.constant dense<0.000000e+00> : vector<32x256xf32>
    %2 = tpu.matmul %0, %1, %cst {dimension_numbers = #tpu.dot_dimension_numbers<[1], [0], [0], [1], [0, 0, 1, 1], [], []>} : vector<32x1152xbf16>, vector<1152x256xbf16>, vector<32x256xf32> -> vector<32x256xf32>
    %c0_3 = arith.constant 0 : index
    %c0_4 = arith.constant 0 : index
    %3 = vector.load %arg3[%c0_3, %c0_4] : memref<1x256xf32, #tpu.memory_space<vmem>>, vector<1x256xf32>
    %4 = vector.broadcast %3 : vector<1x256xf32> to vector<32x256xf32>
    %5 = arith.addf %2, %4 : vector<32x256xf32>
    %c0_5 = arith.constant 0 : index
    %c0_6 = arith.constant 0 : index
    %6 = vector.load %arg4[%c0_5, %c0_6] : memref<32x256xf32, #tpu.memory_space<vmem>>, vector<32x256xf32>
    tpu.vector_store %arg4[%c0_5, %c0_6], %5 {strides = array<i32>} : memref<32x256xf32, #tpu.memory_space<vmem>>, vector<32x256xf32>,
    return
  }
  func.func @transform_0(%arg0: i32) -> (i32, i32) {
    %c0_i32 = arith.constant 0 : i32
    %c0_i32_0 = arith.constant 0 : i32
    return %arg0, %c0_i32 : i32, i32
  }
  func.func @transform_1(%arg0: i32) -> (i32, i32) {
    %c0_i32 = arith.constant 0 : i32
    %c0_i32_0 = arith.constant 0 : i32
    %c0_i32_1 = arith.constant 0 : i32
    return %c0_i32, %c0_i32_0 : i32, i32
  }
  func.func @transform_2(%arg0: i32) -> (i32, i32) {
    %c0_i32 = arith.constant 0 : i32
    %c0_i32_0 = arith.constant 0 : i32
    %c0_i32_1 = arith.constant 0 : i32
    return %c0_i32, %c0_i32_0 : i32, i32
  }
  func.func @transform_3(%arg0: i32) -> (i32, i32) {
    %c0_i32 = arith.constant 0 : i32
    %c0_i32_0 = arith.constant 0 : i32
    return %arg0, %c0_i32 : i32, i32
  }
}

</mosaic_0001>

<bundles_post_ra>
// kernel: _lambda_.3
= control target key start
LH: loop header
LB: loop body
LE: loop exit
PB: predicated region body
PF: predicated region fallthrough
CT: control target
= control target key end

     0   :  { %s2118_s12 = smov 0   ;;  %s2511_s0 = inlined_call_operand.vmem [shape: bf16[4608,128], index: 0, kind: input, shape index: {}]   ;;  %s2512_s1 = inlined_call_operand.vmem [shape: bf16[128,32], index: 1, kind: input, shape index: {}]   ;;  %s2513_s2 = inlined_call_operand.vmem [shape: f32[1,32], index: 2, kind: input, shape index: {}]   ;;  %s2514_s3 = inlined_call_operand.vmem [shape: bf16[4608,32], index: 3, kind: output, shape index: {}]  }
   0x1 LB: > { %s1584_s13 = sadd.s32 4294967295, %s2096_s12   ;;  %p1588_p0 = scmp.ge.s32.totalorder %s2096_s12, 1  ;;  %s2096_s12 = sphi %s2118_s12, %s13_s12  }
   0x2   : > { %p138_p1 = scmp.lt.s32.totalorder %s2096_s12, 7 }
   0x4   : > { %p139_p2 = pnand %p1588_p0, %p138_p1 }
   0x5   : > { %v2034_v0 = vld [vmem:[%s2512_s1] sm:$0xff] (!%p139_p2)   ;;  %s162_s16 = smul.u32 (!%p139_p2), 96, %s1584_s13  ;;  %v2035_v1 = vld [vmem:[%s2512_s1 + $0x8] sm:$0xff] (!%p139_p2)   ;;  %v2036_v2 = vld [vmem:[%s2512_s1 + $0x10] sm:$0xff] (!%p139_p2)   ;;  %vm1431_vm0 = vcmask (!%p139_p2), 257024  }
   0x6   : > { %142 = sbr.rel (%p139_p2) target bundleno = 346 (0x15a), region = 32  ;;  %1898 = vmatprep.subr.bf16.mxu0 (!%p139_p2), %v2034_v0  ;;  %2010 = vmatprep.subr.bf16.mxu1 (!%p139_p2), %v2034_v0  ;;  %v2037_v3 = vld [vmem:[%s2512_s1 + $0x18] sm:$0xff] (!%p139_p2)   ;;  %v2038_v6 = vld [vmem:[%s2512_s1 + $0x20] sm:$0xff] (!%p139_p2)   ;;  %v2039_v7 = vld [vmem:[%s2512_s1 + $0x28] sm:$0xff] (!%p139_p2)  }
   0x7   : > { %p163_p3 = scmp.lt.s32.totalorder (!%p139_p2), %s162_s16, 575  ;;  %1899 = vmatpush3.bf16.msra.mxu0 (!%p139_p2), %v2034_v0  ;;  %2018 = vmatpush3.bf16.msra.mxu1 (!%p139_p2), %v2034_v0  ;;  %v2040_v8 = vld [vmem:[%s2512_s1 + $0x30] sm:$0xff] (!%p139_p2)   ;;  %v2041_v9 = vld [vmem:[%s2512_s1 + $0x38] sm:$0xff] (!%p139_p2)   ;;  %v2211_v56 = vld [vmem:[%s2513_s2] ss:$0 sm:$0xff] (!%p139_p2) }
   0x8   : > { %1900 = vmatprep.subr.bf16.mxu0 (!%p139_p2), %v2035_v1  ;;  %2011 = vmatprep.subr.bf16.mxu1 (!%p139_p2), %v2035_v1 }
   0xb   : > { %1901 = vmatpush3.bf16.msra.mxu0 (!%p139_p2), %v2035_v1  ;;  %2019 = vmatpush3.bf16.msra.mxu1 (!%p139_p2), %v2035_v1 }
   0xc   : > { %1902 = vmatprep.subr.bf16.mxu0 (!%p139_p2), %v2036_v2  ;;  %2012 = vmatprep.subr.bf16.mxu1 (!%p139_p2), %v2036_v2 }
   0xd   : > { %s2516_s16 = smov (!%p163_p3, %s162_s16), 575 }
   0xe   : > { %s1589_s21 = sshll.u32 %s2516_s16, 2 }
   0xf   : > { %s2146_s26 = scalar_lea.vmem %s2511_s0, %s1589_s21  ;;  %1903 = vmatpush3.bf16.msra.mxu0 %v2036_v2  ;;  %2020 = vmatpush3.bf16.msra.mxu1 %v2036_v2  ;;  %s2220_s13 = scalar_lea.vmem %s2514_s3, %s1589_s21 }
  0x10   : > { %v2042_v4 = vld [vmem:[%s2146_s26] sm:$0xff]   ;;  %1904 = vmatprep.subr.bf16.mxu0 %v2037_v3  ;;  %2013 = vmatprep.subr.bf16.mxu1 %v2037_v3  ;;  %v2044_v10 = vld [vmem:[%s2146_s26 + $0x8] sm:$0xff]   ;;  %v2046_v12 = vld [vmem:[%s2146_s26 + $0x10] sm:$0xff]  }
  0x11   : > { %v2043_v5 = vld [vmem:[%s2146_s26 + $0xc0] sm:$0xff]   ;;  %1914 = vmatprep.mubr.bf16.mxu0 %v2042_v4  ;;  %v2045_v11 = vld [vmem:[%s2146_s26 + $0xc8] sm:$0xff]   ;;  %v2047_v13 = vld [vmem:[%s2146_s26 + $0xd0] sm:$0xff]  }
  0x12   : > { %1962 = vmatprep.mubr.bf16.mxu1 %v2043_v5  ;;  %v2048_v14 = vld [vmem:[%s2146_s26 + $0x18] sm:$0xff]   ;;  %v2050_v16 = vld [vmem:[%s2146_s26 + $0x20] sm:$0xff]   ;;  %v2052_v18 = vld [vmem:[%s2146_s26 + $0x28] sm:$0xff]  }
  0x13   : > { %1905 = vmatpush3.bf16.msra.mxu0 %v2037_v3  ;;  %2021 = vmatpush3.bf16.msra.mxu1 %v2037_v3  ;;  %v2049_v15 = vld [vmem:[%s2146_s26 + $0xd8] sm:$0xff]   ;;  %v2051_v17 = vld [vmem:[%s2146_s26 + $0xe0] sm:$0xff]   ;;  %v2053_v19 = vld [vmem:[%s2146_s26 + $0xe8] sm:$0xff]  }
  0x14   : > { %1906 = vmatprep.subr.bf16.mxu0 %v2038_v6  ;;  %2014 = vmatprep.subr.bf16.mxu1 %v2038_v6  ;;  %v2054_v20 = vld [vmem:[%s2146_s26 + $0x30] sm:$0xff]   ;;  %v2056_v22 = vld [vmem:[%s2146_s26 + $0x38] sm:$0xff]   ;;  %v2058_v24 = vld [vmem:[%s2146_s26 + $0x40] sm:$0xff]  }
  0x15   : > { %v2055_v21 = vld [vmem:[%s2146_s26 + $0xf0] sm:$0xff]   ;;  %v2057_v23 = vld [vmem:[%s2146_s26 + $0xf8] sm:$0xff]   ;;  %v2059_v25 = vld [vmem:[%s2146_s26 + $0x100] sm:$0xff]  }
  0x16   : > { %v2060_v26 = vld [vmem:[%s2146_s26 + $0x48] sm:$0xff]   ;;  %v2062_v28 = vld [vmem:[%s2146_s26 + $0x50] sm:$0xff]   ;;  %v2064_v30 = vld [vmem:[%s2146_s26 + $0x58] sm:$0xff]  }
  0x17   : > { %1907 = vmatpush3.bf16.msra.mxu0 %v2038_v6  ;;  %2022 = vmatpush3.bf16.msra.mxu1 %v2038_v6  ;;  %v2061_v27 = vld [vmem:[%s2146_s26 + $0x108] sm:$0xff]   ;;  %v2063_v29 = vld [vmem:[%s2146_s26 + $0x110] sm:$0xff]   ;;  %v2065_v31 = vld [vmem:[%s2146_s26 + $0x118] sm:$0xff]  }
  0x18   : > { %1908 = vmatprep.subr.bf16.mxu0 %v2039_v7  ;;  %2015 = vmatprep.subr.bf16.mxu1 %v2039_v7  ;;  %v2066_v32 = vld [vmem:[%s2146_s26 + $0x60] sm:$0xff]   ;;  %v2068_v34 = vld [vmem:[%s2146_s26 + $0x68] sm:$0xff]   ;;  %v2070_v36 = vld [vmem:[%s2146_s26 + $0x70] sm:$0xff]  }
  0x19   : > { %v2067_v33 = vld [vmem:[%s2146_s26 + $0x120] sm:$0xff]   ;;  %v2069_v35 = vld [vmem:[%s2146_s26 + $0x128] sm:$0xff]   ;;  %v2071_v37 = vld [vmem:[%s2146_s26 + $0x130] sm:$0xff]  }
  0x1a   : > { %v2072_v38 = vld [vmem:[%s2146_s26 + $0x78] sm:$0xff]   ;;  %v2074_v40 = vld [vmem:[%s2146_s26 + $0x80] sm:$0xff]   ;;  %v2076_v42 = vld [vmem:[%s2146_s26 + $0x88] sm:$0xff]  }
  0x1b   : > { %1909 = vmatpush3.bf16.msra.mxu0 %v2039_v7  ;;  %2023 = vmatpush3.bf16.msra.mxu1 %v2039_v7  ;;  %v2073_v39 = vld [vmem:[%s2146_s26 + $0x138] sm:$0xff]   ;;  %v2075_v41 = vld [vmem:[%s2146_s26 + $0x140] sm:$0xff]   ;;  %v2077_v43 = vld [vmem:[%s2146_s26 + $0x148] sm:$0xff]  }
  0x1c   : > { %1910 = vmatprep.subr.bf16.mxu0 %v2040_v8  ;;  %2016 = vmatprep.subr.bf16.mxu1 %v2040_v8  ;;  %v2078_v44 = vld [vmem:[%s2146_s26 + $0x90] sm:$0xff]   ;;  %v2080_v46 = vld [vmem:[%s2146_s26 + $0x98] sm:$0xff]   ;;  %v2082_v48 = vld [vmem:[%s2146_s26 + $0xa0] sm:$0xff]  }
  0x1d   : > { %v2079_v45 = vld [vmem:[%s2146_s26 + $0x150] sm:$0xff]   ;;  %v2081_v47 = vld [vmem:[%s2146_s26 + $0x158] sm:$0xff]   ;;  %v2083_v49 = vld [vmem:[%s2146_s26 + $0x160] sm:$0xff]  }
  0x1e   : > { %v2084_v50 = vld [vmem:[%s2146_s26 + $0xa8] sm:$0xff]   ;;  %v2086_v52 = vld [vmem:[%s2146_s26 + $0xb0] sm:$0xff]   ;;  %v2088_v54 = vld [vmem:[%s2146_s26 + $0xb8] sm:$0xff]  }
  0x1f   : > { %1911 = vmatpush3.bf16.msra.mxu0 %v2040_v8  ;;  %2024 = vmatpush3.bf16.msra.mxu1 %v2040_v8  ;;  %v2085_v51 = vld [vmem:[%s2146_s26 + $0x168] sm:$0xff]   ;;  %v2087_v53 = vld [vmem:[%s2146_s26 + $0x170] sm:$0xff]   ;;  %v2089_v55 = vld [vmem:[%s2146_s26 + $0x178] sm:$0xff]  }
  0x20   : > { %1912 = vmatprep.subr.bf16.mxu0 %v2041_v9  ;;  %2017 = vmatprep.subr.bf16.mxu1 %v2041_v9 }
  0x23   : > { %1913 = vmatpush3.bf16.msra.mxu0 %v2041_v9  ;;  %2025 = vmatpush3.bf16.msra.mxu1 %v2041_v9 }
  0x26   : > { %1915 = vmatmul.mubr.bf16.vlgmr.msra.gmra.mrb[0].mxu0 %v2044_v10  ;;  %1963 = vmatmul.mubr.bf16.vlgmr.msra.gmra.mrb[0].mxu1 %v2045_v11 }
  0x27   : > { %1918 = vmatprep.mubr.bf16.mxu0 %v2046_v12  ;;  %1966 = vmatprep.mubr.bf16.mxu1 %v2047_v13 }
  0x2e   : > { %1919 = vmatmul.mubr.bf16.gmra.mrb[4].mxu0 %v2048_v14  ;;  %1967 = vmatmul.mubr.bf16.gmra.mrb[4].mxu1 %v2049_v15 }
  0x2f   : > { %1922 = vmatprep.mubr.bf16.mxu0 %v2050_v16  ;;  %1970 = vmatprep.mubr.bf16.mxu1 %v2051_v17 }
  0x36   : > { %1923 = vmatmul.mubr.bf16.gmra.mrb[8].mxu0 %v2052_v18  ;;  %1971 = vmatmul.mubr.bf16.gmra.mrb[8].mxu1 %v2053_v19 }
  0x37   : > { %1926 = vmatprep.mubr.bf16.mxu0 %v2054_v20  ;;  %1974 = vmatprep.mubr.bf16.mxu1 %v2055_v21 }
  0x3e   : > { %1927 = vmatmul.mubr.bf16.gmra.mrb[12].mxu0 %v2056_v22  ;;  %1975 = vmatmul.mubr.bf16.gmra.mrb[12].mxu1 %v2057_v23 }
  0x3f   : > { %1930 = vmatprep.mubr.bf16.mxu0 %v2058_v24  ;;  %1978 = vmatprep.mubr.bf16.mxu1 %v2059_v25 }
  0x46   : > { %1931 = vmatmul.mubr.bf16.gmra.mrb[16].mxu0 %v2060_v26  ;;  %1979 = vmatmul.mubr.bf16.gmra.mrb[16].mxu1 %v2061_v27 }
  0x47   : > { %1934 = vmatprep.mubr.bf16.mxu0 %v2062_v28  ;;  %1982 = vmatprep.mubr.bf16.mxu1 %v2063_v29 }
  0x4e   : > { %1935 = vmatmul.mubr.bf16.gmra.mrb[20].mxu0 %v2064_v30  ;;  %1983 = vmatmul.mubr.bf16.gmra.mrb[20].mxu1 %v2065_v31 }
  0x4f   : > { %1938 = vmatprep.mubr.bf16.mxu0 %v2066_v32  ;;  %1986 = vmatprep.mubr.bf16.mxu1 %v2067_v33 }
  0x56   : > { %1939 = vmatmul.mubr.bf16.gmra.mrb[24].mxu0 %v2068_v34  ;;  %1987 = vmatmul.mubr.bf16.gmra.mrb[24].mxu1 %v2069_v35 }
  0x57   : > { %1942 = vmatprep.mubr.bf16.mxu0 %v2070_v36  ;;  %1990 = vmatprep.mubr.bf16.mxu1 %v2071_v37 }
  0x5e   : > { %1943 = vmatmul.mubr.bf16.gmra.mrb[28].mxu0 %v2072_v38  ;;  %1991 = vmatmul.mubr.bf16.gmra.mrb[28].mxu1 %v2073_v39 }
  0x5f   : > { %1946 = vmatprep.mubr.bf16.mxu0 %v2074_v40  ;;  %1994 = vmatprep.mubr.bf16.mxu1 %v2075_v41 }
  0x66   : > { %1947 = vmatmul.mubr.bf16.gmra.mrb[32].mxu0 %v2076_v42  ;;  %1995 = vmatmul.mubr.bf16.gmra.mrb[32].mxu1 %v2077_v43 }
  0x67   : > { %1950 = vmatprep.mubr.bf16.mxu0 %v2078_v44  ;;  %1998 = vmatprep.mubr.bf16.mxu1 %v2079_v45 }
  0x6e   : > { %1951 = vmatmul.mubr.bf16.gmra.mrb[36].mxu0 %v2080_v46  ;;  %1999 = vmatmul.mubr.bf16.gmra.mrb[36].mxu1 %v2081_v47 }
  0x6f   : > { %1954 = vmatprep.mubr.bf16.mxu0 %v2082_v48  ;;  %2002 = vmatprep.mubr.bf16.mxu1 %v2083_v49 }
  0x76   : > { %1955 = vmatmul.mubr.bf16.gmra.mrb[40].mxu0 %v2084_v50  ;;  %2003 = vmatmul.mubr.bf16.gmra.mrb[40].mxu1 %v2085_v51 }
  0x77   : > { %1958 = vmatprep.mubr.bf16.mxu0 %v2086_v52  ;;  %2006 = vmatprep.mubr.bf16.mxu1 %v2087_v53 }
  0x7e   : > { %1959 = vmatmul.mubr.bf16.gmra.mrb[44].mxu0 %v2088_v54  ;;  %2007 = vmatmul.mubr.bf16.gmra.mrb[44].mxu1 %v2089_v55 }
  0xf9   : > { %v1916_v57 = vpop.f32.mrb[0].mxu0  ;;  %v1964_v58 = vpop.f32.mrb[0].mxu1 }
  0xfa   : > { %v673_v59 = vadd.f32 %v1916_v57, %v2211_v56  ;;  %v865_v60 = vadd.f32 %v1964_v58, %v2211_v56  ;;  %v664_v61 = vpop.f32.mrb[1].mxu0  ;;  %v856_v62 = vpop.f32.mrb[1].mxu1 }
  0xfb   : > { %v665_v63 = vadd.f32 %v2211_v56, %v664_v61  ;;  %v857_v0 = vadd.f32 %v2211_v56, %v856_v62  ;;  %v1917_v1 = vpop.f32.mrb[2].mxu0  ;;  %v1965_v2 = vpop.f32.mrb[2].mxu1 }
  0xfc   : > { %v1748_v3 = vpack.c.bf16 %v673_v59, %v673_v59  ;;  %v1796_v4 = vpack.c.bf16 %v865_v60, %v865_v60  ;;  %v676_v5 = vadd.f32 %v1917_v1, %v2211_v56  ;;  %v868_v6 = vadd.f32 %v1965_v2, %v2211_v56  ;;  %v667_v7 = vpop.f32.mrb[3].mxu0  ;;  %v859_v8 = vpop.f32.mrb[3].mxu1 }
  0xfd   : > { %v1746_v9 = vpack.c.bf16 %v665_v63, %v665_v63  ;;  %v1794_v10 = vpack.c.bf16 %v857_v0, %v857_v0  ;;  %v668_v11 = vadd.f32 %v2211_v56, %v667_v7  ;;  %v860_v12 = vadd.f32 %v2211_v56, %v859_v8 }
  0xfe   : > { %1434 = vst.msk [vmem:[%s2220_s13 + $0x8] sm:$0xf] %vm1431_vm0, %v1748_v3  ;;  %1482 = vst.msk [vmem:[%s2220_s13 + $0xc8] sm:$0xf] %vm1431_vm0, %v1796_v4  ;;  %v1749_v13 = vpack.c.bf16 %v676_v5, %v676_v5  ;;  %v1797_v14 = vpack.c.bf16 %v868_v6, %v868_v6 }
  0xff   : > { %1432 = vst.msk [vmem:[%s2220_s13] sm:$0xf] %vm1431_vm0, %v1746_v9  ;;  %1480 = vst.msk [vmem:[%s2220_s13 + $0xc0] sm:$0xf] %vm1431_vm0, %v1794_v10  ;;  %v1747_v15 = vpack.c.bf16 %v668_v11, %v668_v11  ;;  %v1795_v16 = vpack.c.bf16 %v860_v12, %v860_v12 }
 0x100   : > { %1435 = vst.msk [vmem:[%s2220_s13 + $0xc] sm:$0xf] %vm1431_vm0, %v1749_v13  ;;  %1483 = vst.msk [vmem:[%s2220_s13 + $0xcc] sm:$0xf] %vm1431_vm0, %v1797_v14 }
 0x101   : > { %1433 = vst.msk [vmem:[%s2220_s13 + $0x4] sm:$0xf] %vm1431_vm0, %v1747_v15  ;;  %1481 = vst.msk [vmem:[%s2220_s13 + $0xc4] sm:$0xf] %vm1431_vm0, %v1795_v16  ;;  %v1920_v17 = vpop.f32.mrb[4].mxu0  ;;  %v1968_v18 = vpop.f32.mrb[4].mxu1 }
 0x102   : > { %v689_v19 = vadd.f32 %v1920_v17, %v2211_v56  ;;  %v881_v20 = vadd.f32 %v1968_v18, %v2211_v56  ;;  %v680_v21 = vpop.f32.mrb[5].mxu0  ;;  %v872_v22 = vpop.f32.mrb[5].mxu1 }
 0x103   : > { %v681_v23 = vadd.f32 %v2211_v56, %v680_v21  ;;  %v873_v24 = vadd.f32 %v2211_v56, %v872_v22  ;;  %v1921_v25 = vpop.f32.mrb[6].mxu0  ;;  %v1969_v26 = vpop.f32.mrb[6].mxu1 }
 0x104   : > { %v1752_v27 = vpack.c.bf16 %v689_v19, %v689_v19  ;;  %v1800_v28 = vpack.c.bf16 %v881_v20, %v881_v20  ;;  %v692_v29 = vadd.f32 %v1921_v25, %v2211_v56  ;;  %v884_v30 = vadd.f32 %v1969_v26, %v2211_v56  ;;  %v683_v31 = vpop.f32.mrb[7].mxu0  ;;  %v875_v32 = vpop.f32.mrb[7].mxu1 }
 0x105   : > { %v1750_v33 = vpack.c.bf16 %v681_v23, %v681_v23  ;;  %v1798_v34 = vpack.c.bf16 %v873_v24, %v873_v24  ;;  %v684_v35 = vadd.f32 %v2211_v56, %v683_v31  ;;  %v876_v36 = vadd.f32 %v2211_v56, %v875_v32 }
 0x106   : > { %1438 = vst.msk [vmem:[%s2220_s13 + $0x18] sm:$0xf] %vm1431_vm0, %v1752_v27  ;;  %1486 = vst.msk [vmem:[%s2220_s13 + $0xd8] sm:$0xf] %vm1431_vm0, %v1800_v28  ;;  %v1753_v37 = vpack.c.bf16 %v692_v29, %v692_v29  ;;  %v1801_v38 = vpack.c.bf16 %v884_v30, %v884_v30 }
 0x107   : > { %1436 = vst.msk [vmem:[%s2220_s13 + $0x10] sm:$0xf] %vm1431_vm0, %v1750_v33  ;;  %1484 = vst.msk [vmem:[%s2220_s13 + $0xd0] sm:$0xf] %vm1431_vm0, %v1798_v34  ;;  %v1751_v39 = vpack.c.bf16 %v684_v35, %v684_v35  ;;  %v1799_v40 = vpack.c.bf16 %v876_v36, %v876_v36 }
 0x108   : > { %1439 = vst.msk [vmem:[%s2220_s13 + $0x1c] sm:$0xf] %vm1431_vm0, %v1753_v37  ;;  %1487 = vst.msk [vmem:[%s2220_s13 + $0xdc] sm:$0xf] %vm1431_vm0, %v1801_v38 }
 0x109   : > { %1437 = vst.msk [vmem:[%s2220_s13 + $0x14] sm:$0xf] %vm1431_vm0, %v1751_v39  ;;  %1485 = vst.msk [vmem:[%s2220_s13 + $0xd4] sm:$0xf] %vm1431_vm0, %v1799_v40  ;;  %v1924_v41 = vpop.f32.mrb[8].mxu0  ;;  %v1972_v42 = vpop.f32.mrb[8].mxu1 }
 0x10a   : > { %v705_v43 = vadd.f32 %v1924_v41, %v2211_v56  ;;  %v897_v44 = vadd.f32 %v1972_v42, %v2211_v56  ;;  %v696_v45 = vpop.f32.mrb[9].mxu0  ;;  %v888_v46 = vpop.f32.mrb[9].mxu1 }
 0x10b   : > { %v697_v47 = vadd.f32 %v2211_v56, %v696_v45  ;;  %v889_v48 = vadd.f32 %v2211_v56, %v888_v46  ;;  %v1925_v49 = vpop.f32.mrb[10].mxu0  ;;  %v1973_v50 = vpop.f32.mrb[10].mxu1 }
 0x10c   : > { %v1756_v51 = vpack.c.bf16 %v705_v43, %v705_v43  ;;  %v1804_v52 = vpack.c.bf16 %v897_v44, %v897_v44  ;;  %v708_v53 = vadd.f32 %v1925_v49, %v2211_v56  ;;  %v900_v54 = vadd.f32 %v1973_v50, %v2211_v56  ;;  %v699_v55 = vpop.f32.mrb[11].mxu0  ;;  %v891_v57 = vpop.f32.mrb[11].mxu1 }
 0x10d   : > { %v1754_v58 = vpack.c.bf16 %v697_v47, %v697_v47  ;;  %v1802_v59 = vpack.c.bf16 %v889_v48, %v889_v48  ;;  %v700_v60 = vadd.f32 %v2211_v56, %v699_v55  ;;  %v892_v61 = vadd.f32 %v2211_v56, %v891_v57 }
 0x10e   : > { %1442 = vst.msk [vmem:[%s2220_s13 + $0x28] sm:$0xf] %vm1431_vm0, %v1756_v51  ;;  %1490 = vst.msk [vmem:[%s2220_s13 + $0xe8] sm:$0xf] %vm1431_vm0, %v1804_v52  ;;  %v1757_v62 = vpack.c.bf16 %v708_v53, %v708_v53  ;;  %v1805_v63 = vpack.c.bf16 %v900_v54, %v900_v54 }
 0x10f   : > { %1440 = vst.msk [vmem:[%s2220_s13 + $0x20] sm:$0xf] %vm1431_vm0, %v1754_v58  ;;  %1488 = vst.msk [vmem:[%s2220_s13 + $0xe0] sm:$0xf] %vm1431_vm0, %v1802_v59  ;;  %v1755_v0 = vpack.c.bf16 %v700_v60, %v700_v60  ;;  %v1803_v1 = vpack.c.bf16 %v892_v61, %v892_v61 }
 0x110   : > { %1443 = vst.msk [vmem:[%s2220_s13 + $0x2c] sm:$0xf] %vm1431_vm0, %v1757_v62  ;;  %1491 = vst.msk [vmem:[%s2220_s13 + $0xec] sm:$0xf] %vm1431_vm0, %v1805_v63 }
 0x111   : > { %1441 = vst.msk [vmem:[%s2220_s13 + $0x24] sm:$0xf] %vm1431_vm0, %v1755_v0  ;;  %1489 = vst.msk [vmem:[%s2220_s13 + $0xe4] sm:$0xf] %vm1431_vm0, %v1803_v1  ;;  %v1928_v2 = vpop.f32.mrb[12].mxu0  ;;  %v1976_v3 = vpop.f32.mrb[12].mxu1 }
 0x112   : > { %v721_v4 = vadd.f32 %v1928_v2, %v2211_v56  ;;  %v913_v5 = vadd.f32 %v1976_v3, %v2211_v56  ;;  %v712_v6 = vpop.f32.mrb[13].mxu0  ;;  %v904_v7 = vpop.f32.mrb[13].mxu1 }
 0x113   : > { %v713_v8 = vadd.f32 %v2211_v56, %v712_v6  ;;  %v905_v9 = vadd.f32 %v2211_v56, %v904_v7  ;;  %v1929_v10 = vpop.f32.mrb[14].mxu0  ;;  %v1977_v11 = vpop.f32.mrb[14].mxu1 }
 0x114   : > { %v1760_v12 = vpack.c.bf16 %v721_v4, %v721_v4  ;;  %v1808_v13 = vpack.c.bf16 %v913_v5, %v913_v5  ;;  %v724_v14 = vadd.f32 %v1929_v10, %v2211_v56  ;;  %v916_v15 = vadd.f32 %v1977_v11, %v2211_v56  ;;  %v715_v16 = vpop.f32.mrb[15].mxu0  ;;  %v907_v17 = vpop.f32.mrb[15].mxu1 }
 0x115   : > { %v1758_v18 = vpack.c.bf16 %v713_v8, %v713_v8  ;;  %v1806_v19 = vpack.c.bf16 %v905_v9, %v905_v9  ;;  %v716_v20 = vadd.f32 %v2211_v56, %v715_v16  ;;  %v908_v21 = vadd.f32 %v2211_v56, %v907_v17 }
 0x116   : > { %1446 = vst.msk [vmem:[%s2220_s13 + $0x38] sm:$0xf] %vm1431_vm0, %v1760_v12  ;;  %1494 = vst.msk [vmem:[%s2220_s13 + $0xf8] sm:$0xf] %vm1431_vm0, %v1808_v13  ;;  %v1761_v22 = vpack.c.bf16 %v724_v14, %v724_v14  ;;  %v1809_v23 = vpack.c.bf16 %v916_v15, %v916_v15 }
 0x117   : > { %1444 = vst.msk [vmem:[%s2220_s13 + $0x30] sm:$0xf] %vm1431_vm0, %v1758_v18  ;;  %1492 = vst.msk [vmem:[%s2220_s13 + $0xf0] sm:$0xf] %vm1431_vm0, %v1806_v19  ;;  %v1759_v24 = vpack.c.bf16 %v716_v20, %v716_v20  ;;  %v1807_v25 = vpack.c.bf16 %v908_v21, %v908_v21 }
 0x118   : > { %1447 = vst.msk [vmem:[%s2220_s13 + $0x3c] sm:$0xf] %vm1431_vm0, %v1761_v22  ;;  %1495 = vst.msk [vmem:[%s2220_s13 + $0xfc] sm:$0xf] %vm1431_vm0, %v1809_v23 }
 0x119   : > { %1445 = vst.msk [vmem:[%s2220_s13 + $0x34] sm:$0xf] %vm1431_vm0, %v1759_v24  ;;  %1493 = vst.msk [vmem:[%s2220_s13 + $0xf4] sm:$0xf] %vm1431_vm0, %v1807_v25  ;;  %v1932_v26 = vpop.f32.mrb[16].mxu0  ;;  %v1980_v27 = vpop.f32.mrb[16].mxu1 }
 0x11a   : > { %v737_v28 = vadd.f32 %v1932_v26, %v2211_v56  ;;  %v929_v29 = vadd.f32 %v1980_v27, %v2211_v56  ;;  %v728_v30 = vpop.f32.mrb[17].mxu0  ;;  %v920_v31 = vpop.f32.mrb[17].mxu1 }
 0x11b   : > { %v729_v32 = vadd.f32 %v2211_v56, %v728_v30  ;;  %v921_v33 = vadd.f32 %v2211_v56, %v920_v31  ;;  %v1933_v34 = vpop.f32.mrb[18].mxu0  ;;  %v1981_v35 = vpop.f32.mrb[18].mxu1 }
 0x11c   : > { %v1764_v36 = vpack.c.bf16 %v737_v28, %v737_v28  ;;  %v1812_v37 = vpack.c.bf16 %v929_v29, %v929_v29  ;;  %v740_v38 = vadd.f32 %v1933_v34, %v2211_v56  ;;  %v932_v39 = vadd.f32 %v1981_v35, %v2211_v56  ;;  %v731_v40 = vpop.f32.mrb[19].mxu0  ;;  %v923_v41 = vpop.f32.mrb[19].mxu1 }
 0x11d   : > { %v1762_v42 = vpack.c.bf16 %v729_v32, %v729_v32  ;;  %v1810_v43 = vpack.c.bf16 %v921_v33, %v921_v33  ;;  %v732_v44 = vadd.f32 %v2211_v56, %v731_v40  ;;  %v924_v45 = vadd.f32 %v2211_v56, %v923_v41 }
 0x11e   : > { %1450 = vst.msk [vmem:[%s2220_s13 + $0x48] sm:$0xf] %vm1431_vm0, %v1764_v36  ;;  %1498 = vst.msk [vmem:[%s2220_s13 + $0x108] sm:$0xf] %vm1431_vm0, %v1812_v37  ;;  %v1765_v46 = vpack.c.bf16 %v740_v38, %v740_v38  ;;  %v1813_v47 = vpack.c.bf16 %v932_v39, %v932_v39 }
 0x11f   : > { %1448 = vst.msk [vmem:[%s2220_s13 + $0x40] sm:$0xf] %vm1431_vm0, %v1762_v42  ;;  %1496 = vst.msk [vmem:[%s2220_s13 + $0x100] sm:$0xf] %vm1431_vm0, %v1810_v43  ;;  %v1763_v48 = vpack.c.bf16 %v732_v44, %v732_v44  ;;  %v1811_v49 = vpack.c.bf16 %v924_v45, %v924_v45 }
 0x120   : > { %1451 = vst.msk [vmem:[%s2220_s13 + $0x4c] sm:$0xf] %vm1431_vm0, %v1765_v46  ;;  %1499 = vst.msk [vmem:[%s2220_s13 + $0x10c] sm:$0xf] %vm1431_vm0, %v1813_v47 }
 0x121   : > { %1449 = vst.msk [vmem:[%s2220_s13 + $0x44] sm:$0xf] %vm1431_vm0, %v1763_v48  ;;  %1497 = vst.msk [vmem:[%s2220_s13 + $0x104] sm:$0xf] %vm1431_vm0, %v1811_v49  ;;  %v1936_v50 = vpop.f32.mrb[20].mxu0  ;;  %v1984_v51 = vpop.f32.mrb[20].mxu1 }
 0x122   : > { %v753_v52 = vadd.f32 %v1936_v50, %v2211_v56  ;;  %v945_v53 = vadd.f32 %v1984_v51, %v2211_v56  ;;  %v744_v54 = vpop.f32.mrb[21].mxu0  ;;  %v936_v55 = vpop.f32.mrb[21].mxu1 }
 0x123   : > { %v745_v57 = vadd.f32 %v2211_v56, %v744_v54  ;;  %v937_v58 = vadd.f32 %v2211_v56, %v936_v55  ;;  %v1937_v59 = vpop.f32.mrb[22].mxu0  ;;  %v1985_v60 = vpop.f32.mrb[22].mxu1 }
 0x124   : > { %v1768_v61 = vpack.c.bf16 %v753_v52, %v753_v52  ;;  %v1816_v62 = vpack.c.bf16 %v945_v53, %v945_v53  ;;  %v756_v63 = vadd.f32 %v1937_v59, %v2211_v56  ;;  %v948_v0 = vadd.f32 %v1985_v60, %v2211_v56  ;;  %v747_v1 = vpop.f32.mrb[23].mxu0  ;;  %v939_v2 = vpop.f32.mrb[23].mxu1 }
 0x125   : > { %v1766_v3 = vpack.c.bf16 %v745_v57, %v745_v57  ;;  %v1814_v4 = vpack.c.bf16 %v937_v58, %v937_v58  ;;  %v748_v5 = vadd.f32 %v2211_v56, %v747_v1  ;;  %v940_v6 = vadd.f32 %v2211_v56, %v939_v2 }
 0x126   : > { %1454 = vst.msk [vmem:[%s2220_s13 + $0x58] sm:$0xf] %vm1431_vm0, %v1768_v61  ;;  %1502 = vst.msk [vmem:[%s2220_s13 + $0x118] sm:$0xf] %vm1431_vm0, %v1816_v62  ;;  %v1769_v7 = vpack.c.bf16 %v756_v63, %v756_v63  ;;  %v1817_v8 = vpack.c.bf16 %v948_v0, %v948_v0 }
 0x127   : > { %1452 = vst.msk [vmem:[%s2220_s13 + $0x50] sm:$0xf] %vm1431_vm0, %v1766_v3  ;;  %1500 = vst.msk [vmem:[%s2220_s13 + $0x110] sm:$0xf] %vm1431_vm0, %v1814_v4  ;;  %v1767_v9 = vpack.c.bf16 %v748_v5, %v748_v5  ;;  %v1815_v10 = vpack.c.bf16 %v940_v6, %v940_v6 }
 0x128   : > { %1455 = vst.msk [vmem:[%s2220_s13 + $0x5c] sm:$0xf] %vm1431_vm0, %v1769_v7  ;;  %1503 = vst.msk [vmem:[%s2220_s13 + $0x11c] sm:$0xf] %vm1431_vm0, %v1817_v8 }
 0x129   : > { %1453 = vst.msk [vmem:[%s2220_s13 + $0x54] sm:$0xf] %vm1431_vm0, %v1767_v9  ;;  %1501 = vst.msk [vmem:[%s2220_s13 + $0x114] sm:$0xf] %vm1431_vm0, %v1815_v10  ;;  %v1940_v11 = vpop.f32.mrb[24].mxu0  ;;  %v1988_v12 = vpop.f32.mrb[24].mxu1 }
 0x12a   : > { %v769_v13 = vadd.f32 %v1940_v11, %v2211_v56  ;;  %v961_v14 = vadd.f32 %v1988_v12, %v2211_v56  ;;  %v760_v15 = vpop.f32.mrb[25].mxu0  ;;  %v952_v16 = vpop.f32.mrb[25].mxu1 }
 0x12b   : > { %v761_v17 = vadd.f32 %v2211_v56, %v760_v15  ;;  %v953_v18 = vadd.f32 %v2211_v56, %v952_v16  ;;  %v1941_v19 = vpop.f32.mrb[26].mxu0  ;;  %v1989_v20 = vpop.f32.mrb[26].mxu1 }
 0x12c   : > { %v1772_v21 = vpack.c.bf16 %v769_v13, %v769_v13  ;;  %v1820_v22 = vpack.c.bf16 %v961_v14, %v961_v14  ;;  %v772_v23 = vadd.f32 %v1941_v19, %v2211_v56  ;;  %v964_v24 = vadd.f32 %v1989_v20, %v2211_v56  ;;  %v763_v25 = vpop.f32.mrb[27].mxu0  ;;  %v955_v26 = vpop.f32.mrb[27].mxu1 }
 0x12d   : > { %v1770_v27 = vpack.c.bf16 %v761_v17, %v761_v17  ;;  %v1818_v28 = vpack.c.bf16 %v953_v18, %v953_v18  ;;  %v764_v29 = vadd.f32 %v2211_v56, %v763_v25  ;;  %v956_v30 = vadd.f32 %v2211_v56, %v955_v26 }
 0x12e   : > { %1458 = vst.msk [vmem:[%s2220_s13 + $0x68] sm:$0xf] %vm1431_vm0, %v1772_v21  ;;  %1506 = vst.msk [vmem:[%s2220_s13 + $0x128] sm:$0xf] %vm1431_vm0, %v1820_v22  ;;  %v1773_v31 = vpack.c.bf16 %v772_v23, %v772_v23  ;;  %v1821_v32 = vpack.c.bf16 %v964_v24, %v964_v24 }
 0x12f   : > { %1456 = vst.msk [vmem:[%s2220_s13 + $0x60] sm:$0xf] %vm1431_vm0, %v1770_v27  ;;  %1504 = vst.msk [vmem:[%s2220_s13 + $0x120] sm:$0xf] %vm1431_vm0, %v1818_v28  ;;  %v1771_v33 = vpack.c.bf16 %v764_v29, %v764_v29  ;;  %v1819_v34 = vpack.c.bf16 %v956_v30, %v956_v30 }
 0x130   : > { %1459 = vst.msk [vmem:[%s2220_s13 + $0x6c] sm:$0xf] %vm1431_vm0, %v1773_v31  ;;  %1507 = vst.msk [vmem:[%s2220_s13 + $0x12c] sm:$0xf] %vm1431_vm0, %v1821_v32 }
 0x131   : > { %1457 = vst.msk [vmem:[%s2220_s13 + $0x64] sm:$0xf] %vm1431_vm0, %v1771_v33  ;;  %1505 = vst.msk [vmem:[%s2220_s13 + $0x124] sm:$0xf] %vm1431_vm0, %v1819_v34  ;;  %v1944_v35 = vpop.f32.mrb[28].mxu0  ;;  %v1992_v36 = vpop.f32.mrb[28].mxu1 }
 0x132   : > { %v785_v37 = vadd.f32 %v1944_v35, %v2211_v56  ;;  %v977_v38 = vadd.f32 %v1992_v36, %v2211_v56  ;;  %v776_v39 = vpop.f32.mrb[29].mxu0  ;;  %v968_v40 = vpop.f32.mrb[29].mxu1 }
 0x133   : > { %v777_v41 = vadd.f32 %v2211_v56, %v776_v39  ;;  %v969_v42 = vadd.f32 %v2211_v56, %v968_v40  ;;  %v1945_v43 = vpop.f32.mrb[30].mxu0  ;;  %v1993_v44 = vpop.f32.mrb[30].mxu1 }
 0x134   : > { %v1776_v45 = vpack.c.bf16 %v785_v37, %v785_v37  ;;  %v1824_v46 = vpack.c.bf16 %v977_v38, %v977_v38  ;;  %v788_v47 = vadd.f32 %v1945_v43, %v2211_v56  ;;  %v980_v48 = vadd.f32 %v1993_v44, %v2211_v56  ;;  %v779_v49 = vpop.f32.mrb[31].mxu0  ;;  %v971_v50 = vpop.f32.mrb[31].mxu1 }
 0x135   : > { %v1774_v51 = vpack.c.bf16 %v777_v41, %v777_v41  ;;  %v1822_v52 = vpack.c.bf16 %v969_v42, %v969_v42  ;;  %v780_v53 = vadd.f32 %v2211_v56, %v779_v49  ;;  %v972_v54 = vadd.f32 %v2211_v56, %v971_v50 }
 0x136   : > { %1462 = vst.msk [vmem:[%s2220_s13 + $0x78] sm:$0xf] %vm1431_vm0, %v1776_v45  ;;  %1510 = vst.msk [vmem:[%s2220_s13 + $0x138] sm:$0xf] %vm1431_vm0, %v1824_v46  ;;  %v1777_v55 = vpack.c.bf16 %v788_v47, %v788_v47  ;;  %v1825_v57 = vpack.c.bf16 %v980_v48, %v980_v48 }
 0x137   : > { %1460 = vst.msk [vmem:[%s2220_s13 + $0x70] sm:$0xf] %vm1431_vm0, %v1774_v51  ;;  %1508 = vst.msk [vmem:[%s2220_s13 + $0x130] sm:$0xf] %vm1431_vm0, %v1822_v52  ;;  %v1775_v58 = vpack.c.bf16 %v780_v53, %v780_v53  ;;  %v1823_v59 = vpack.c.bf16 %v972_v54, %v972_v54 }
 0x138   : > { %1463 = vst.msk [vmem:[%s2220_s13 + $0x7c] sm:$0xf] %vm1431_vm0, %v1777_v55  ;;  %1511 = vst.msk [vmem:[%s2220_s13 + $0x13c] sm:$0xf] %vm1431_vm0, %v1825_v57 }
 0x139   : > { %1461 = vst.msk [vmem:[%s2220_s13 + $0x74] sm:$0xf] %vm1431_vm0, %v1775_v58  ;;  %1509 = vst.msk [vmem:[%s2220_s13 + $0x134] sm:$0xf] %vm1431_vm0, %v1823_v59  ;;  %v1948_v60 = vpop.f32.mrb[32].mxu0  ;;  %v1996_v61 = vpop.f32.mrb[32].mxu1 }
 0x13a   : > { %v801_v62 = vadd.f32 %v1948_v60, %v2211_v56  ;;  %v993_v63 = vadd.f32 %v1996_v61, %v2211_v56  ;;  %v792_v0 = vpop.f32.mrb[33].mxu0  ;;  %v984_v1 = vpop.f32.mrb[33].mxu1 }
 0x13b   : > { %v793_v2 = vadd.f32 %v2211_v56, %v792_v0  ;;  %v985_v3 = vadd.f32 %v2211_v56, %v984_v1  ;;  %v1949_v4 = vpop.f32.mrb[34].mxu0  ;;  %v1997_v5 = vpop.f32.mrb[34].mxu1 }
 0x13c   : > { %v1780_v6 = vpack.c.bf16 %v801_v62, %v801_v62  ;;  %v1828_v7 = vpack.c.bf16 %v993_v63, %v993_v63  ;;  %v804_v8 = vadd.f32 %v1949_v4, %v2211_v56  ;;  %v996_v9 = vadd.f32 %v1997_v5, %v2211_v56  ;;  %v795_v10 = vpop.f32.mrb[35].mxu0  ;;  %v987_v11 = vpop.f32.mrb[35].mxu1 }
 0x13d   : > { %v1778_v12 = vpack.c.bf16 %v793_v2, %v793_v2  ;;  %v1826_v13 = vpack.c.bf16 %v985_v3, %v985_v3  ;;  %v796_v14 = vadd.f32 %v2211_v56, %v795_v10  ;;  %v988_v15 = vadd.f32 %v2211_v56, %v987_v11 }
 0x13e   : > { %1466 = vst.msk [vmem:[%s2220_s13 + $0x88] sm:$0xf] %vm1431_vm0, %v1780_v6  ;;  %1514 = vst.msk [vmem:[%s2220_s13 + $0x148] sm:$0xf] %vm1431_vm0, %v1828_v7  ;;  %v1781_v16 = vpack.c.bf16 %v804_v8, %v804_v8  ;;  %v1829_v17 = vpack.c.bf16 %v996_v9, %v996_v9 }
 0x13f   : > { %1464 = vst.msk [vmem:[%s2220_s13 + $0x80] sm:$0xf] %vm1431_vm0, %v1778_v12  ;;  %1512 = vst.msk [vmem:[%s2220_s13 + $0x140] sm:$0xf] %vm1431_vm0, %v1826_v13  ;;  %v1779_v18 = vpack.c.bf16 %v796_v14, %v796_v14  ;;  %v1827_v19 = vpack.c.bf16 %v988_v15, %v988_v15 }
 0x140   : > { %1467 = vst.msk [vmem:[%s2220_s13 + $0x8c] sm:$0xf] %vm1431_vm0, %v1781_v16  ;;  %1515 = vst.msk [vmem:[%s2220_s13 + $0x14c] sm:$0xf] %vm1431_vm0, %v1829_v17 }
 0x141   : > { %1465 = vst.msk [vmem:[%s2220_s13 + $0x84] sm:$0xf] %vm1431_vm0, %v1779_v18  ;;  %1513 = vst.msk [vmem:[%s2220_s13 + $0x144] sm:$0xf] %vm1431_vm0, %v1827_v19  ;;  %v1952_v20 = vpop.f32.mrb[36].mxu0  ;;  %v2000_v21 = vpop.f32.mrb[36].mxu1 }
 0x142   : > { %v817_v22 = vadd.f32 %v1952_v20, %v2211_v56  ;;  %v1009_v23 = vadd.f32 %v2000_v21, %v2211_v56  ;;  %v808_v24 = vpop.f32.mrb[37].mxu0  ;;  %v1000_v25 = vpop.f32.mrb[37].mxu1 }
 0x143   : > { %v809_v26 = vadd.f32 %v2211_v56, %v808_v24  ;;  %v1001_v27 = vadd.f32 %v2211_v56, %v1000_v25  ;;  %v1953_v28 = vpop.f32.mrb[38].mxu0  ;;  %v2001_v29 = vpop.f32.mrb[38].mxu1 }
 0x144   : > { %v1784_v30 = vpack.c.bf16 %v817_v22, %v817_v22  ;;  %v1832_v31 = vpack.c.bf16 %v1009_v23, %v1009_v23  ;;  %v820_v32 = vadd.f32 %v1953_v28, %v2211_v56  ;;  %v1012_v33 = vadd.f32 %v2001_v29, %v2211_v56  ;;  %v811_v34 = vpop.f32.mrb[39].mxu0  ;;  %v1003_v35 = vpop.f32.mrb[39].mxu1 }
 0x145   : > { %v1782_v36 = vpack.c.bf16 %v809_v26, %v809_v26  ;;  %v1830_v37 = vpack.c.bf16 %v1001_v27, %v1001_v27  ;;  %v812_v38 = vadd.f32 %v2211_v56, %v811_v34  ;;  %v1004_v39 = vadd.f32 %v2211_v56, %v1003_v35 }
 0x146   : > { %1470 = vst.msk [vmem:[%s2220_s13 + $0x98] sm:$0xf] %vm1431_vm0, %v1784_v30  ;;  %1518 = vst.msk [vmem:[%s2220_s13 + $0x158] sm:$0xf] %vm1431_vm0, %v1832_v31  ;;  %v1785_v40 = vpack.c.bf16 %v820_v32, %v820_v32  ;;  %v1833_v41 = vpack.c.bf16 %v1012_v33, %v1012_v33 }
 0x147   : > { %1468 = vst.msk [vmem:[%s2220_s13 + $0x90] sm:$0xf] %vm1431_vm0, %v1782_v36  ;;  %1516 = vst.msk [vmem:[%s2220_s13 + $0x150] sm:$0xf] %vm1431_vm0, %v1830_v37  ;;  %v1783_v42 = vpack.c.bf16 %v812_v38, %v812_v38  ;;  %v1831_v43 = vpack.c.bf16 %v1004_v39, %v1004_v39 }
 0x148   : > { %1471 = vst.msk [vmem:[%s2220_s13 + $0x9c] sm:$0xf] %vm1431_vm0, %v1785_v40  ;;  %1519 = vst.msk [vmem:[%s2220_s13 + $0x15c] sm:$0xf] %vm1431_vm0, %v1833_v41 }
 0x149   : > { %1469 = vst.msk [vmem:[%s2220_s13 + $0x94] sm:$0xf] %vm1431_vm0, %v1783_v42  ;;  %1517 = vst.msk [vmem:[%s2220_s13 + $0x154] sm:$0xf] %vm1431_vm0, %v1831_v43  ;;  %v1956_v44 = vpop.f32.mrb[40].mxu0  ;;  %v2004_v45 = vpop.f32.mrb[40].mxu1 }
 0x14a   : > { %v833_v46 = vadd.f32 %v1956_v44, %v2211_v56  ;;  %v1025_v47 = vadd.f32 %v2004_v45, %v2211_v56  ;;  %v824_v48 = vpop.f32.mrb[41].mxu0  ;;  %v1016_v49 = vpop.f32.mrb[41].mxu1 }
 0x14b   : > { %v825_v50 = vadd.f32 %v2211_v56, %v824_v48  ;;  %v1017_v51 = vadd.f32 %v2211_v56, %v1016_v49  ;;  %v1957_v52 = vpop.f32.mrb[42].mxu0  ;;  %v2005_v53 = vpop.f32.mrb[42].mxu1 }
 0x14c   : > { %v1788_v54 = vpack.c.bf16 %v833_v46, %v833_v46  ;;  %v1836_v55 = vpack.c.bf16 %v1025_v47, %v1025_v47  ;;  %v836_v57 = vadd.f32 %v1957_v52, %v2211_v56  ;;  %v1028_v58 = vadd.f32 %v2005_v53, %v2211_v56  ;;  %v827_v59 = vpop.f32.mrb[43].mxu0  ;;  %v1019_v60 = vpop.f32.mrb[43].mxu1 }
 0x14d   : > { %v1786_v61 = vpack.c.bf16 %v825_v50, %v825_v50  ;;  %v1834_v62 = vpack.c.bf16 %v1017_v51, %v1017_v51  ;;  %v828_v63 = vadd.f32 %v2211_v56, %v827_v59  ;;  %v1020_v0 = vadd.f32 %v2211_v56, %v1019_v60 }
 0x14e   : > { %1474 = vst.msk [vmem:[%s2220_s13 + $0xa8] sm:$0xf] %vm1431_vm0, %v1788_v54  ;;  %1522 = vst.msk [vmem:[%s2220_s13 + $0x168] sm:$0xf] %vm1431_vm0, %v1836_v55  ;;  %v1789_v1 = vpack.c.bf16 %v836_v57, %v836_v57  ;;  %v1837_v2 = vpack.c.bf16 %v1028_v58, %v1028_v58 }
 0x14f   : > { %1472 = vst.msk [vmem:[%s2220_s13 + $0xa0] sm:$0xf] %vm1431_vm0, %v1786_v61  ;;  %1520 = vst.msk [vmem:[%s2220_s13 + $0x160] sm:$0xf] %vm1431_vm0, %v1834_v62  ;;  %v1787_v3 = vpack.c.bf16 %v828_v63, %v828_v63  ;;  %v1835_v4 = vpack.c.bf16 %v1020_v0, %v1020_v0 }
 0x150   : > { %1475 = vst.msk [vmem:[%s2220_s13 + $0xac] sm:$0xf] %vm1431_vm0, %v1789_v1  ;;  %1523 = vst.msk [vmem:[%s2220_s13 + $0x16c] sm:$0xf] %vm1431_vm0, %v1837_v2 }
 0x151   : > { %1473 = vst.msk [vmem:[%s2220_s13 + $0xa4] sm:$0xf] %vm1431_vm0, %v1787_v3  ;;  %1521 = vst.msk [vmem:[%s2220_s13 + $0x164] sm:$0xf] %vm1431_vm0, %v1835_v4  ;;  %v1960_v5 = vpop.f32.mrb[44].mxu0  ;;  %v2008_v6 = vpop.f32.mrb[44].mxu1 }
 0x152   : > { %v849_v7 = vadd.f32 %v1960_v5, %v2211_v56  ;;  %v1041_v8 = vadd.f32 %v2008_v6, %v2211_v56  ;;  %v840_v9 = vpop.f32.mrb[45].mxu0  ;;  %v1032_v10 = vpop.f32.mrb[45].mxu1 }
 0x153   : > { %v841_v11 = vadd.f32 %v2211_v56, %v840_v9  ;;  %v1033_v12 = vadd.f32 %v2211_v56, %v1032_v10  ;;  %v1961_v13 = vpop.f32.mrb[46].mxu0  ;;  %v2009_v14 = vpop.f32.mrb[46].mxu1 }
 0x154   : > { %v1792_v15 = vpack.c.bf16 %v849_v7, %v849_v7  ;;  %v1840_v16 = vpack.c.bf16 %v1041_v8, %v1041_v8  ;;  %v852_v17 = vadd.f32 %v1961_v13, %v2211_v56  ;;  %v1044_v18 = vadd.f32 %v2009_v14, %v2211_v56  ;;  %v843_v19 = vpop.f32.mrb[47].mxu0  ;;  %v1035_v20 = vpop.f32.mrb[47].mxu1 }
 0x155   : > { %v1790_v21 = vpack.c.bf16 %v841_v11, %v841_v11  ;;  %v1838_v22 = vpack.c.bf16 %v1033_v12, %v1033_v12  ;;  %v844_v23 = vadd.f32 %v2211_v56, %v843_v19  ;;  %v1036_v24 = vadd.f32 %v2211_v56, %v1035_v20 }
 0x156   : > { %1478 = vst.msk [vmem:[%s2220_s13 + $0xb8] sm:$0xf] %vm1431_vm0, %v1792_v15  ;;  %1526 = vst.msk [vmem:[%s2220_s13 + $0x178] sm:$0xf] %vm1431_vm0, %v1840_v16  ;;  %v1793_v25 = vpack.c.bf16 %v852_v17, %v852_v17  ;;  %v1841_v26 = vpack.c.bf16 %v1044_v18, %v1044_v18 }
 0x157   : > { %1476 = vst.msk [vmem:[%s2220_s13 + $0xb0] sm:$0xf] %vm1431_vm0, %v1790_v21  ;;  %1524 = vst.msk [vmem:[%s2220_s13 + $0x170] sm:$0xf] %vm1431_vm0, %v1838_v22  ;;  %v1791_v27 = vpack.c.bf16 %v844_v23, %v844_v23  ;;  %v1839_v28 = vpack.c.bf16 %v1036_v24, %v1036_v24 }
 0x158   : > { %1479 = vst.msk [vmem:[%s2220_s13 + $0xbc] sm:$0xf] %vm1431_vm0, %v1793_v25  ;;  %1527 = vst.msk [vmem:[%s2220_s13 + $0x17c] sm:$0xf] %vm1431_vm0, %v1841_v26 }
 0x159   : > { %1477 = vst.msk [vmem:[%s2220_s13 + $0xb4] sm:$0xf] %vm1431_vm0, %v1791_v27  ;;  %1525 = vst.msk [vmem:[%s2220_s13 + $0x174] sm:$0xf] %vm1431_vm0, %v1839_v28 }
 0x15a PF: > { %s13_s12 = sadd.s32 1, %s2096_s12  }
 0x15b   : > { %p10_p4 = scmp.ge.s32.totalorder %s13_s12, 8  }
 0x15d   :  { %12 = sbr.rel (!%p10_p4) target bundleno = 1 (0x1), region = 62 }

// kernel: _lambda_.4
= control target key start
LH: loop header
LB: loop body
LE: loop exit
PB: predicated region body
PF: predicated region fallthrough
CT: control target
= control target key end

     0   :  { %v2501_v0 = vmov 0   ;;  %s3190_s1 = inlined_call_operand.vmem [shape: bf16[384,128], index: 1, kind: input, shape index: {}]   ;;  %s3191_s0 = inlined_call_operand.vmem [shape: bf16[512,384], index: 0, kind: input, shape index: {}]   ;;  %s3192_s2 = inlined_call_operand.vmem [shape: f32[1,128], index: 2, kind: input, shape index: {}]   ;;  %s3193_s3 = inlined_call_operand.vmem [shape: bf16[512,128], index: 3, kind: output, shape index: {}]  }
   0x1   :  { %854 = vmatprep.subr.bf16.mxu0 %v2501_v0  ;;  %2316 = vmatprep.subr.bf16.mxu1 %v2501_v0  ;;  %v2349_v1 = vld [vmem:[%s3190_s1] sm:$0xff]   ;;  %v2350_v2 = vld [vmem:[%s3190_s1 + $0x8] sm:$0xff]   ;;  %v2351_v3 = vld [vmem:[%s3190_s1 + $0x10] sm:$0xff]  }
   0x2   :  { %855 = vmatpush1.bf16.msra.mxu0 %v2349_v1  ;;  %2332 = vmatpush1.bf16.msra.mxu1 %v2349_v1  ;;  %v2352_v4 = vld [vmem:[%s3190_s1 + $0x18] sm:$0xff]   ;;  %v2353_v5 = vld [vmem:[%s3190_s1 + $0x20] sm:$0xff]   ;;  %v2354_v7 = vld [vmem:[%s3190_s1 + $0x28] sm:$0xff]  }
   0x3   :  { %856 = vmatprep.subr.bf16.mxu0 %v2501_v0  ;;  %2317 = vmatprep.subr.bf16.mxu1 %v2501_v0  ;;  %v2367_v6 = vld [vmem:[%s3191_s0 + $0x4] ss:$12 sps:$4 sm:$0xff]   ;;  %v2356_v10 = vld [vmem:[%s3190_s1 + $0x38] sm:$0xff]   ;;  %v2358_v12 = vld [vmem:[%s3190_s1 + $0x48] sm:$0xff]  }
   0x4   :  { %v2370_v8 = vld [vmem:[%s3191_s0 + $0x244] ss:$12 sps:$4 sm:$0xff]   ;;  %886 = vmatprep.mubr.bf16.mxu0 %v2367_v6  ;;  %v2360_v14 = vld [vmem:[%s3190_s1 + $0x58] sm:$0xff]   ;;  %v2362_v16 = vld [vmem:[%s3190_s1 + $0x68] sm:$0xff]  }
   0x5   :  { %1078 = vmatprep.mubr.bf16.mxu1 %v2370_v8  ;;  %v2355_v9 = vld [vmem:[%s3190_s1 + $0x30] sm:$0xff]   ;;  %v2357_v11 = vld [vmem:[%s3190_s1 + $0x40] sm:$0xff]   ;;  %v2364_v18 = vld [vmem:[%s3190_s1 + $0x78] sm:$0xff]  }
   0x6   :  { %857 = vmatpush1.bf16.msra.mxu0 %v2350_v2  ;;  %2333 = vmatpush1.bf16.msra.mxu1 %v2350_v2  ;;  %v2359_v13 = vld [vmem:[%s3190_s1 + $0x50] sm:$0xff]   ;;  %v2361_v15 = vld [vmem:[%s3190_s1 + $0x60] sm:$0xff]   ;;  %v2372_v22 = vld [vmem:[%s3191_s0 + $0x1c] ss:$12 sps:$4 sm:$0xff]  }
   0x7   :  { %858 = vmatprep.subr.bf16.mxu0 %v2501_v0  ;;  %2318 = vmatprep.subr.bf16.mxu1 %v2501_v0  ;;  %v2363_v17 = vld [vmem:[%s3190_s1 + $0x70] sm:$0xff]   ;;  %v2371_v19 = vld [vmem:[%s3190_s1 + $0x80] sm:$0xff]   ;;  %v2374_v23 = vld [vmem:[%s3191_s0 + $0x25c] ss:$12 sps:$4 sm:$0xff]  }
   0x8   :  { %v2365_v20 = vld [vmem:[%s3191_s0] ss:$12 sps:$4 sm:$0xff]   ;;  %v2385_v25 = vld [vmem:[%s3190_s1 + $0x90] sm:$0xff]   ;;  %v2376_v26 = vld [vmem:[%s3191_s0 + $0x18] ss:$12 sps:$4 sm:$0xff]  }
   0x9   :  { %v2368_v21 = vld [vmem:[%s3191_s0 + $0x240] ss:$12 sps:$4 sm:$0xff]   ;;  %v2377_v27 = vld [vmem:[%s3191_s0 + $0x258] ss:$12 sps:$4 sm:$0xff]   ;;  %v2383_v31 = vld [vmem:[%s3191_s0 + $0x30] ss:$12 sps:$4 sm:$0xff]  }
   0xa   :  { %859 = vmatpush1.bf16.msra.mxu0 %v2351_v3  ;;  %2334 = vmatpush1.bf16.msra.mxu1 %v2351_v3  ;;  %v2378_v24 = vld [vmem:[%s3190_s1 + $0x88] sm:$0xff]   ;;  %v2379_v28 = vld [vmem:[%s3191_s0 + $0x34] ss:$12 sps:$4 sm:$0xff]   ;;  %v2392_v30 = vld [vmem:[%s3190_s1 + $0x98] sm:$0xff]  }
   0xb   :  { %860 = vmatprep.subr.bf16.mxu0 %v2501_v0  ;;  %2319 = vmatprep.subr.bf16.mxu1 %v2501_v0  ;;  %v2381_v29 = vld [vmem:[%s3191_s0 + $0x274] ss:$12 sps:$4 sm:$0xff]   ;;  %v2384_v33 = vld [vmem:[%s3191_s0 + $0x270] ss:$12 sps:$4 sm:$0xff]   ;;  %v2386_v34 = vld [vmem:[%s3191_s0 + $0x4c] ss:$12 sps:$4 sm:$0xff]  }
   0xc   :  { %v2399_v32 = vld [vmem:[%s3190_s1 + $0xa0] sm:$0xff]   ;;  %v2388_v35 = vld [vmem:[%s3191_s0 + $0x28c] ss:$12 sps:$4 sm:$0xff]   ;;  %v2390_v37 = vld [vmem:[%s3191_s0 + $0x48] ss:$12 sps:$4 sm:$0xff]  }
   0xd   :  { %v2406_v36 = vld [vmem:[%s3190_s1 + $0xa8] sm:$0xff]   ;;  %v2393_v39 = vld [vmem:[%s3191_s0 + $0x64] ss:$12 sps:$4 sm:$0xff]   ;;  %v2420_v42 = vld [vmem:[%s3190_s1 + $0xb8] sm:$0xff]  }
   0xe   :  { %861 = vmatpush1.bf16.msra.mxu0 %v2352_v4  ;;  %2335 = vmatpush1.bf16.msra.mxu1 %v2352_v4  ;;  %v2391_v38 = vld [vmem:[%s3191_s0 + $0x288] ss:$12 sps:$4 sm:$0xff]   ;;  %v2395_v40 = vld [vmem:[%s3191_s0 + $0x2a4] ss:$12 sps:$4 sm:$0xff]   ;;  %v2397_v43 = vld [vmem:[%s3191_s0 + $0x60] ss:$12 sps:$4 sm:$0xff]  }
   0xf   :  { %862 = vmatprep.subr.bf16.mxu0 %v2501_v0  ;;  %2320 = vmatprep.subr.bf16.mxu1 %v2501_v0  ;;  %v2413_v41 = vld [vmem:[%s3190_s1 + $0xb0] sm:$0xff]   ;;  %v2398_v44 = vld [vmem:[%s3191_s0 + $0x2a0] ss:$12 sps:$4 sm:$0xff]   ;;  %v2400_v45 = vld [vmem:[%s3191_s0 + $0x7c] ss:$12 sps:$4 sm:$0xff]  }
  0x10   :  { %v2402_v46 = vld [vmem:[%s3191_s0 + $0x2bc] ss:$12 sps:$4 sm:$0xff]   ;;  %v2404_v47 = vld [vmem:[%s3191_s0 + $0x78] ss:$12 sps:$4 sm:$0xff]   ;;  %v2407_v49 = vld [vmem:[%s3191_s0 + $0x94] ss:$12 sps:$4 sm:$0xff]  }
  0x11   :  { %v2405_v48 = vld [vmem:[%s3191_s0 + $0x2b8] ss:$12 sps:$4 sm:$0xff]   ;;  %v2409_v50 = vld [vmem:[%s3191_s0 + $0x2d4] ss:$12 sps:$4 sm:$0xff]   ;;  %v2411_v51 = vld [vmem:[%s3191_s0 + $0x90] ss:$12 sps:$4 sm:$0xff]  }
  0x12   :  { %863 = vmatpush1.bf16.msra.mxu0 %v2353_v5  ;;  %2336 = vmatpush1.bf16.msra.mxu1 %v2353_v5  ;;  %v2412_v52 = vld [vmem:[%s3191_s0 + $0x2d0] ss:$12 sps:$4 sm:$0xff]   ;;  %v2414_v53 = vld [vmem:[%s3191_s0 + $0xac] ss:$12 sps:$4 sm:$0xff]   ;;  %v2418_v55 = vld [vmem:[%s3191_s0 + $0xa8] ss:$12 sps:$4 sm:$0xff]  }
  0x13   :  { %864 = vmatprep.subr.bf16.mxu0 %v2501_v0  ;;  %2321 = vmatprep.subr.bf16.mxu1 %v2501_v0  ;;  %v2416_v54 = vld [vmem:[%s3191_s0 + $0x2ec] ss:$12 sps:$4 sm:$0xff]   ;;  %v2419_v56 = vld [vmem:[%s3191_s0 + $0x2e8] ss:$12 sps:$4 sm:$0xff]   ;;  %v2421_v57 = vld [vmem:[%s3191_s0 + $0xc4] ss:$12 sps:$4 sm:$0xff]  }
  0x14   :  { %v2423_v58 = vld [vmem:[%s3191_s0 + $0x8] ss:$12 sps:$4 sm:$0xff]   ;;  %v2424_v59 = vld [vmem:[%s3191_s0 + $0xc0] ss:$12 sps:$4 sm:$0xff]   ;;  %v2428_v62 = vld [vmem:[%s3191_s0 + $0x38] ss:$12 sps:$4 sm:$0xff]  }
  0x15   :  { %v2425_v60 = vld [vmem:[%s3191_s0 + $0x20] ss:$12 sps:$4 sm:$0xff]   ;;  %v2426_v61 = vld [vmem:[%s3191_s0 + $0xdc] ss:$12 sps:$4 sm:$0xff]   ;;  %v2429_v63 = vld [vmem:[%s3191_s0 + $0xd8] ss:$12 sps:$4 sm:$0xff]  }
  0x16   :  { %865 = vmatpush1.bf16.msra.mxu0 %v2354_v7  ;;  %2337 = vmatpush1.bf16.msra.mxu1 %v2354_v7  ;;  %v2431_v1 = vld [vmem:[%s3191_s0 + $0xf4] ss:$12 sps:$4 sm:$0xff]   ;;  %v2434_v3 = vld [vmem:[%s3191_s0 + $0xf0] ss:$12 sps:$4 sm:$0xff]   ;;  %v2436_v5 = vld [vmem:[%s3191_s0 + $0x10c] ss:$12 sps:$4 sm:$0xff]  }
  0x17   :  { %866 = vmatprep.subr.bf16.mxu0 %v2501_v0  ;;  %2322 = vmatprep.subr.bf16.mxu1 %v2501_v0  ;;  %v2433_v2 = vld [vmem:[%s3191_s0 + $0x68] ss:$12 sps:$4 sm:$0xff]   ;;  %v2435_v4 = vld [vmem:[%s3191_s0 + $0x80] ss:$12 sps:$4 sm:$0xff]   ;;  %v2438_v6 = vld [vmem:[%s3191_s0 + $0x98] ss:$12 sps:$4 sm:$0xff]  }
  0x18   :  { %v2439_v7 = vld [vmem:[%s3191_s0 + $0x108] ss:$12 sps:$4 sm:$0xff]   ;;  %v2440_v8 = vld [vmem:[%s3191_s0 + $0xb0] ss:$12 sps:$4 sm:$0xff]  }
  0x1a   :  { %867 = vmatpush1.bf16.msra.mxu0 %v2355_v9  ;;  %2338 = vmatpush1.bf16.msra.mxu1 %v2355_v9  ;;  %v2441_v9 = vld [vmem:[%s3191_s0 + $0x124] ss:$12 sps:$4 sm:$0xff]  }
  0x1b   :  { %868 = vmatprep.subr.bf16.mxu0 %v2501_v0  ;;  %2323 = vmatprep.subr.bf16.mxu1 %v2501_v0 }
  0x1e   :  { %869 = vmatpush1.bf16.msra.mxu0 %v2356_v10  ;;  %2339 = vmatpush1.bf16.msra.mxu1 %v2356_v10  ;;  %v2443_v10 = vld [vmem:[%s3191_s0 + $0xc8] ss:$12 sps:$4 sm:$0xff]  }
  0x1f   :  { %870 = vmatprep.subr.bf16.mxu0 %v2501_v0  ;;  %2324 = vmatprep.subr.bf16.mxu1 %v2501_v0 }
  0x22   :  { %871 = vmatpush1.bf16.msra.mxu0 %v2357_v11  ;;  %2340 = vmatpush1.bf16.msra.mxu1 %v2357_v11  ;;  %v2444_v11 = vld [vmem:[%s3191_s0 + $0x120] ss:$12 sps:$4 sm:$0xff]  }
  0x23   :  { %872 = vmatprep.subr.bf16.mxu0 %v2501_v0  ;;  %2325 = vmatprep.subr.bf16.mxu1 %v2501_v0 }
  0x26   :  { %873 = vmatpush1.bf16.msra.mxu0 %v2358_v12  ;;  %2341 = vmatpush1.bf16.msra.mxu1 %v2358_v12  ;;  %v2445_v12 = vld [vmem:[%s3191_s0 + $0xe0] ss:$12 sps:$4 sm:$0xff]  }
  0x27   :  { %874 = vmatprep.subr.bf16.mxu0 %v2501_v0  ;;  %2326 = vmatprep.subr.bf16.mxu1 %v2501_v0 }
  0x2a   :  { %875 = vmatpush1.bf16.msra.mxu0 %v2359_v13  ;;  %2342 = vmatpush1.bf16.msra.mxu1 %v2359_v13  ;;  %v2446_v13 = vld [vmem:[%s3191_s0 + $0x13c] ss:$12 sps:$4 sm:$0xff]  }
  0x2b   :  { %876 = vmatprep.subr.bf16.mxu0 %v2501_v0  ;;  %2327 = vmatprep.subr.bf16.mxu1 %v2501_v0 }
  0x2e   :  { %877 = vmatpush1.bf16.msra.mxu0 %v2360_v14  ;;  %2343 = vmatpush1.bf16.msra.mxu1 %v2360_v14  ;;  %v2448_v14 = vld [vmem:[%s3191_s0 + $0xf8] ss:$12 sps:$4 sm:$0xff]  }
  0x2f   :  { %878 = vmatprep.subr.bf16.mxu0 %v2501_v0  ;;  %2328 = vmatprep.subr.bf16.mxu1 %v2501_v0 }
  0x32   :  { %879 = vmatpush1.bf16.msra.mxu0 %v2361_v15  ;;  %2344 = vmatpush1.bf16.msra.mxu1 %v2361_v15  ;;  %v2449_v15 = vld [vmem:[%s3191_s0 + $0x138] ss:$12 sps:$4 sm:$0xff]  }
  0x33   :  { %880 = vmatprep.subr.bf16.mxu0 %v2501_v0  ;;  %2329 = vmatprep.subr.bf16.mxu1 %v2501_v0 }
  0x36   :  { %881 = vmatpush1.bf16.msra.mxu0 %v2362_v16  ;;  %2345 = vmatpush1.bf16.msra.mxu1 %v2362_v16  ;;  %v2450_v16 = vld [vmem:[%s3191_s0 + $0x110] ss:$12 sps:$4 sm:$0xff]  }
  0x37   :  { %882 = vmatprep.subr.bf16.mxu0 %v2501_v0  ;;  %2330 = vmatprep.subr.bf16.mxu1 %v2501_v0 }
  0x3a   :  { %883 = vmatpush1.bf16.msra.mxu0 %v2363_v17  ;;  %2346 = vmatpush1.bf16.msra.mxu1 %v2363_v17  ;;  %v2451_v17 = vld [vmem:[%s3191_s0 + $0x154] ss:$12 sps:$4 sm:$0xff]  }
  0x3b   :  { %884 = vmatprep.subr.bf16.mxu0 %v2501_v0  ;;  %2331 = vmatprep.subr.bf16.mxu1 %v2501_v0  ;;  %v2430_v0 = vld [vmem:[%s3191_s0 + $0x50] ss:$12 sps:$4 sm:$0xff]  }
  0x3e   :  { %885 = vmatpush1.bf16.msra.mxu0 %v2364_v18  ;;  %2347 = vmatpush1.bf16.msra.mxu1 %v2364_v18  ;;  %v2453_v18 = vld [vmem:[%s3191_s0 + $0x128] ss:$12 sps:$4 sm:$0xff]  }
  0x3f   :  { %2236 = vmatprep.subr.bf16.mxu1 %v2371_v19 }
  0x41   :  { %887 = vmatmul.mubr.bf16.vlgmr.msra.gmra.mrb[0].mxu0 %v2365_v20  ;;  %1079 = vmatmul.mubr.bf16.vlgmr.msra.gmra.mrb[0].mxu1 %v2368_v21  ;;  %v2455_v20 = vld [vmem:[%s3191_s0 + $0x140] ss:$12 sps:$4 sm:$0xff]  }
  0x42   :  { %2237 = vmatpush3.bf16.msra.mxu1 %v2371_v19  ;;  %894 = vmatprep.mubr.bf16.mxu0 %v2372_v22  ;;  %v2454_v19 = vld [vmem:[%s3191_s0 + $0x150] ss:$12 sps:$4 sm:$0xff]   ;;  %v2456_v21 = vld [vmem:[%s3191_s0 + $0x16c] ss:$12 sps:$4 sm:$0xff]  }
  0x43   :  { %1086 = vmatprep.mubr.bf16.mxu1 %v2374_v23  ;;  %2238 = vmatprep.subr.bf16.mxu1 %v2378_v24  ;;  %v2458_v22 = vld [vmem:[%s3191_s0 + $0x158] ss:$12 sps:$4 sm:$0xff]   ;;  %v2459_v23 = vld [vmem:[%s3191_s0 + $0x168] ss:$12 sps:$4 sm:$0xff]  }
  0x46   :  { %2239 = vmatpush3.bf16.msra.mxu1 %v2378_v24  ;;  %v2460_v24 = vld [vmem:[%s3191_s0 + $0x170] ss:$12 sps:$4 sm:$0xff]  }
  0x47   :  { %2240 = vmatprep.subr.bf16.mxu1 %v2385_v25 }
  0x49   :  { %895 = vmatmul.mubr.bf16.gmra.mrb[4].mxu0 %v2376_v26  ;;  %1087 = vmatmul.mubr.bf16.gmra.mrb[4].mxu1 %v2377_v27  ;;  %v2463_v26 = vld [vmem:[%s3191_s0 + $0x188] ss:$12 sps:$4 sm:$0xff]   ;;  %v2464_v27 = vld [vmem:[%s3191_s0 + $0x180] ss:$12 sps:$4 sm:$0xff]  }
  0x4a   :  { %902 = vmatprep.mubr.bf16.mxu0 %v2379_v28  ;;  %1094 = vmatprep.mubr.bf16.mxu1 %v2381_v29  ;;  %v2465_v28 = vld [vmem:[%s3191_s0 + $0x1a0] ss:$12 sps:$4 sm:$0xff]   ;;  %v2466_v29 = vld [vmem:[%s3191_s0 + $0x19c] ss:$12 sps:$4 sm:$0xff]  }
  0x4b   :  { %2241 = vmatpush3.bf16.msra.mxu1 %v2385_v25  ;;  %v2461_v25 = vld [vmem:[%s3191_s0 + $0x184] ss:$12 sps:$4 sm:$0xff]  }
  0x4c   :  { %2242 = vmatprep.subr.bf16.mxu1 %v2392_v30 }
  0x4f   :  { %2243 = vmatpush3.bf16.msra.mxu1 %v2392_v30  ;;  %v2468_v30 = vld [vmem:[%s3191_s0 + $0x1b8] ss:$12 sps:$4 sm:$0xff]  }
  0x50   :  { %2244 = vmatprep.subr.bf16.mxu1 %v2399_v32 }
  0x51   :  { %903 = vmatmul.mubr.bf16.gmra.mrb[8].mxu0 %v2383_v31  ;;  %1095 = vmatmul.mubr.bf16.gmra.mrb[8].mxu1 %v2384_v33  ;;  %v2469_v31 = vld [vmem:[%s3191_s0 + $0x198] ss:$12 sps:$4 sm:$0xff]   ;;  %v2471_v33 = vld [vmem:[%s3191_s0 + $0x1b4] ss:$12 sps:$4 sm:$0xff]  }
  0x52   :  { %910 = vmatprep.mubr.bf16.mxu0 %v2386_v34  ;;  %1102 = vmatprep.mubr.bf16.mxu1 %v2388_v35  ;;  %v2473_v34 = vld [vmem:[%s3191_s0 + $0x1e8] ss:$12 sps:$4 sm:$0xff]   ;;  %v2474_v35 = vld [vmem:[%s3191_s0 + $0x1b0] ss:$12 sps:$4 sm:$0xff]  }
  0x53   :  { %2245 = vmatpush3.bf16.msra.mxu1 %v2399_v32  ;;  %v2470_v32 = vld [vmem:[%s3191_s0 + $0x1d0] ss:$12 sps:$4 sm:$0xff]  }
  0x54   :  { %2246 = vmatprep.subr.bf16.mxu1 %v2406_v36 }
  0x57   :  { %2247 = vmatpush3.bf16.msra.mxu1 %v2406_v36  ;;  %v2475_v36 = vld [vmem:[%s3191_s0 + $0x200] ss:$12 sps:$4 sm:$0xff]  }
  0x58   :  { %2248 = vmatprep.subr.bf16.mxu1 %v2413_v41 }
  0x59   :  { %911 = vmatmul.mubr.bf16.gmra.mrb[12].mxu0 %v2390_v37  ;;  %1103 = vmatmul.mubr.bf16.gmra.mrb[12].mxu1 %v2391_v38  ;;  %v2476_v37 = vld [vmem:[%s3191_s0 + $0x1cc] ss:$12 sps:$4 sm:$0xff]  }
  0x5a   :  { %918 = vmatprep.mubr.bf16.mxu0 %v2393_v39  ;;  %1110 = vmatprep.mubr.bf16.mxu1 %v2395_v40  ;;  %v2478_v38 = vld [vmem:[%s3191_s0 + $0x218] ss:$12 sps:$4 sm:$0xff]   ;;  %v2479_v39 = vld [vmem:[%s3191_s0 + $0x1c8] ss:$12 sps:$4 sm:$0xff]   ;;  %v2480_v40 = vld [vmem:[%s3191_s0 + $0x230] ss:$12 sps:$4 sm:$0xff]  }
  0x5b   :  { %2249 = vmatpush3.bf16.msra.mxu1 %v2413_v41  ;;  %v2481_v41 = vld [vmem:[%s3191_s0 + $0x1e4] ss:$12 sps:$4 sm:$0xff]  }
  0x5c   :  { %2250 = vmatprep.subr.bf16.mxu1 %v2420_v42 }
  0x5f   :  { %2251 = vmatpush3.bf16.msra.mxu1 %v2420_v42  ;;  %v2483_v42 = vld [vmem:[%s3191_s0 + $0x248] ss:$12 sps:$4 sm:$0xff]  }
  0x61   :  { %919 = vmatmul.mubr.bf16.gmra.mrb[16].mxu0 %v2397_v43  ;;  %1111 = vmatmul.mubr.bf16.gmra.mrb[16].mxu1 %v2398_v44  ;;  %v2484_v43 = vld [vmem:[%s3191_s0 + $0x1e0] ss:$12 sps:$4 sm:$0xff]  }
  0x62   :  { %926 = vmatprep.mubr.bf16.mxu0 %v2400_v45  ;;  %1118 = vmatprep.mubr.bf16.mxu1 %v2402_v46  ;;  %v2485_v44 = vld [vmem:[%s3191_s0 + $0x260] ss:$12 sps:$4 sm:$0xff]   ;;  %v2486_v45 = vld [vmem:[%s3191_s0 + $0x1fc] ss:$12 sps:$4 sm:$0xff]   ;;  %v2488_v46 = vld [vmem:[%s3191_s0 + $0x278] ss:$12 sps:$4 sm:$0xff]  }
  0x69   :  { %927 = vmatmul.mubr.bf16.gmra.mrb[20].mxu0 %v2404_v47  ;;  %1119 = vmatmul.mubr.bf16.gmra.mrb[20].mxu1 %v2405_v48  ;;  %v2489_v47 = vld [vmem:[%s3191_s0 + $0x1f8] ss:$12 sps:$4 sm:$0xff]   ;;  %v2490_v48 = vld [vmem:[%s3191_s0 + $0x290] ss:$12 sps:$4 sm:$0xff]  }
  0x6a   :  { %934 = vmatprep.mubr.bf16.mxu0 %v2407_v49  ;;  %1126 = vmatprep.mubr.bf16.mxu1 %v2409_v50  ;;  %v2491_v49 = vld [vmem:[%s3191_s0 + $0x214] ss:$12 sps:$4 sm:$0xff]  }
  0x6b   :  { %v2493_v50 = vld [vmem:[%s3191_s0 + $0x2a8] ss:$12 sps:$4 sm:$0xff]  }
  0x71   :  { %935 = vmatmul.mubr.bf16.gmra.mrb[24].mxu0 %v2411_v51  ;;  %1127 = vmatmul.mubr.bf16.gmra.mrb[24].mxu1 %v2412_v52  ;;  %v2494_v51 = vld [vmem:[%s3191_s0 + $0x210] ss:$12 sps:$4 sm:$0xff]   ;;  %v2495_v52 = vld [vmem:[%s3191_s0 + $0x2c0] ss:$12 sps:$4 sm:$0xff]  }
  0x72   :  { %942 = vmatprep.mubr.bf16.mxu0 %v2414_v53  ;;  %1134 = vmatprep.mubr.bf16.mxu1 %v2416_v54  ;;  %v2496_v53 = vld [vmem:[%s3191_s0 + $0x22c] ss:$12 sps:$4 sm:$0xff]  }
  0x73   :  { %v2498_v54 = vld [vmem:[%s3191_s0 + $0x2d8] ss:$12 sps:$4 sm:$0xff]  }
  0x79   :  { %943 = vmatmul.mubr.bf16.gmra.mrb[28].mxu0 %v2418_v55  ;;  %1135 = vmatmul.mubr.bf16.gmra.mrb[28].mxu1 %v2419_v56  ;;  %v2499_v55 = vld [vmem:[%s3191_s0 + $0x228] ss:$12 sps:$4 sm:$0xff]   ;;  %v2500_v56 = vld [vmem:[%s3191_s0 + $0x2f0] ss:$12 sps:$4 sm:$0xff]  }
  0x7a   :  { %950 = vmatprep.mubr.bf16.mxu0 %v2421_v57  ;;  %2252 = vmatprep.mubr.bf16.mxu1 %v2423_v58 }
  0x81   :  { %951 = vmatmul.mubr.bf16.gmra.mrb[32].mxu0 %v2424_v59  ;;  %2253 = vmatmul.mubr.bf16.vlgmr.msra.gmra.mrb[32].mxu1 %v2425_v60 }
  0x82   :  { %958 = vmatprep.mubr.bf16.mxu0 %v2426_v61  ;;  %2256 = vmatprep.mubr.bf16.mxu1 %v2428_v62 }
  0x89   :  { %959 = vmatmul.mubr.bf16.gmra.mrb[36].mxu0 %v2429_v63  ;;  %2257 = vmatmul.mubr.bf16.gmra.mrb[36].mxu1 %v2430_v0 }
  0x8a   :  { %966 = vmatprep.mubr.bf16.mxu0 %v2431_v1  ;;  %2260 = vmatprep.mubr.bf16.mxu1 %v2433_v2 }
  0x91   :  { %967 = vmatmul.mubr.bf16.gmra.mrb[40].mxu0 %v2434_v3  ;;  %2261 = vmatmul.mubr.bf16.gmra.mrb[40].mxu1 %v2435_v4 }
  0x92   :  { %974 = vmatprep.mubr.bf16.mxu0 %v2436_v5  ;;  %2264 = vmatprep.mubr.bf16.mxu1 %v2438_v6 }
  0x99   :  { %975 = vmatmul.mubr.bf16.gmra.mrb[44].mxu0 %v2439_v7  ;;  %2265 = vmatmul.mubr.bf16.gmra.mrb[44].mxu1 %v2440_v8 }
  0x9a   :  { %982 = vmatprep.mubr.bf16.mxu0 %v2441_v9  ;;  %2268 = vmatprep.mubr.bf16.mxu1 %v2443_v10 }
  0xa1   :  { %983 = vmatmul.mubr.bf16.gmra.mrb[48].mxu0 %v2444_v11  ;;  %2269 = vmatmul.mubr.bf16.gmra.mrb[48].mxu1 %v2445_v12 }
  0xa2   :  { %990 = vmatprep.mubr.bf16.mxu0 %v2446_v13  ;;  %2272 = vmatprep.mubr.bf16.mxu1 %v2448_v14 }
  0xa9   :  { %991 = vmatmul.mubr.bf16.gmra.mrb[52].mxu0 %v2449_v15  ;;  %2273 = vmatmul.mubr.bf16.gmra.mrb[52].mxu1 %v2450_v16 }
  0xaa   :  { %998 = vmatprep.mubr.bf16.mxu0 %v2451_v17  ;;  %2276 = vmatprep.mubr.bf16.mxu1 %v2453_v18 }
  0xb1   :  { %999 = vmatmul.mubr.bf16.gmra.mrb[56].mxu0 %v2454_v19  ;;  %2277 = vmatmul.mubr.bf16.gmra.mrb[56].mxu1 %v2455_v20 }
  0xb2   :  { %1006 = vmatprep.mubr.bf16.mxu0 %v2456_v21  ;;  %2280 = vmatprep.mubr.bf16.mxu1 %v2458_v22 }
  0xb9   :  { %1007 = vmatmul.mubr.bf16.gmra.mrb[60].mxu0 %v2459_v23  ;;  %2281 = vmatmul.mubr.bf16.gmra.mrb[60].mxu1 %v2460_v24 }
  0xba   :  { %1014 = vmatprep.mubr.bf16.mxu0 %v2461_v25  ;;  %2284 = vmatprep.mubr.bf16.mxu1 %v2463_v26 }
  0xc1   :  { %1015 = vmatmul.mubr.bf16.gmra.mrb[64].mxu0 %v2464_v27  ;;  %2285 = vmatmul.mubr.bf16.gmra.mrb[64].mxu1 %v2465_v28 }
  0xc2   :  { %1022 = vmatprep.mubr.bf16.mxu0 %v2466_v29  ;;  %2288 = vmatprep.mubr.bf16.mxu1 %v2468_v30 }
  0xc9   :  { %1023 = vmatmul.mubr.bf16.gmra.mrb[68].mxu0 %v2469_v31  ;;  %2289 = vmatmul.mubr.bf16.gmra.mrb[68].mxu1 %v2470_v32 }
  0xca   :  { %1030 = vmatprep.mubr.bf16.mxu0 %v2471_v33  ;;  %2292 = vmatprep.mubr.bf16.mxu1 %v2473_v34 }
  0xd1   :  { %1031 = vmatmul.mubr.bf16.gmra.mrb[72].mxu0 %v2474_v35  ;;  %2293 = vmatmul.mubr.bf16.gmra.mrb[72].mxu1 %v2475_v36 }
  0xd2   :  { %1038 = vmatprep.mubr.bf16.mxu0 %v2476_v37  ;;  %2296 = vmatprep.mubr.bf16.mxu1 %v2478_v38 }
  0xd9   :  { %1039 = vmatmul.mubr.bf16.gmra.mrb[76].mxu0 %v2479_v39  ;;  %2297 = vmatmul.mubr.bf16.gmra.mrb[76].mxu1 %v2480_v40 }
  0xda   :  { %1046 = vmatprep.mubr.bf16.mxu0 %v2481_v41  ;;  %2300 = vmatprep.mubr.bf16.mxu1 %v2483_v42 }
  0xe1   :  { %1047 = vmatmul.mubr.bf16.gmra.mrb[80].mxu0 %v2484_v43  ;;  %2301 = vmatmul.mubr.bf16.gmra.mrb[80].mxu1 %v2485_v44 }
  0xe2   :  { %1054 = vmatprep.mubr.bf16.mxu0 %v2486_v45  ;;  %2304 = vmatprep.mubr.bf16.mxu1 %v2488_v46 }
  0xe9   :  { %1055 = vmatmul.mubr.bf16.gmra.mrb[84].mxu0 %v2489_v47  ;;  %2305 = vmatmul.mubr.bf16.gmra.mrb[84].mxu1 %v2490_v48 }
  0xea   :  { %1062 = vmatprep.mubr.bf16.mxu0 %v2491_v49  ;;  %2308 = vmatprep.mubr.bf16.mxu1 %v2493_v50 }
  0xf1   :  { %1063 = vmatmul.mubr.bf16.gmra.mrb[88].mxu0 %v2494_v51  ;;  %2309 = vmatmul.mubr.bf16.gmra.mrb[88].mxu1 %v2495_v52 }
  0xf2   :  { %1070 = vmatprep.mubr.bf16.mxu0 %v2496_v53  ;;  %2312 = vmatprep.mubr.bf16.mxu1 %v2498_v54 }
  0xf9   :  { %1071 = vmatmul.mubr.bf16.gmra.mrb[92].mxu0 %v2499_v55  ;;  %2313 = vmatmul.mubr.bf16.gmra.mrb[92].mxu1 %v2500_v56 }
 0x114   :  { %v2914_v57 = vpop.f32.mrb[0].mxu0  ;;  %v2916_v58 = vpop.f32.mrb[0].mxu1 }
 0x115   :  { %v890_v59 = vpop.f32.mrb[1].mxu0  ;;  %v1082_v60 = vpop.f32.mrb[1].mxu1 }
 0x116   :  { %v2918_v61 = vpop.f32.mrb[2].mxu0  ;;  %v2920_v62 = vpop.f32.mrb[2].mxu1  ;;  %v2975_v59 = vld [vmem:[%s3192_s2] ss:$0 sm:$0xff] }
 0x117   :  { %v893_v63 = vpop.f32.mrb[3].mxu0  ;;  %v1085_v0 = vpop.f32.mrb[3].mxu1 }
 0x118   :  { %v889_v63 = vadd.f32 %v2975_v59, %v2914_v57 }
 0x11c   :  { %v896_v1 = vpop.f32.mrb[4].mxu0  ;;  %v2922_v2 = vpop.f32.mrb[4].mxu1 }
 0x11d   :  { %v898_v3 = vpop.f32.mrb[5].mxu0  ;;  %v1090_v4 = vpop.f32.mrb[5].mxu1  ;;  %v897_v60 = vadd.f32 %v2975_v59, %v896_v1 }
 0x11e   :  { %v899_v5 = vpop.f32.mrb[6].mxu0  ;;  %v2924_v6 = vpop.f32.mrb[6].mxu1 }
 0x11f   :  { %v901_v7 = vpop.f32.mrb[7].mxu0  ;;  %v1093_v8 = vpop.f32.mrb[7].mxu1  ;;  %v900_v4 = vadd.f32 %v2975_v59, %v899_v5 }
 0x124   :  { %v2926_v9 = vpop.f32.mrb[8].mxu0  ;;  %v2928_v10 = vpop.f32.mrb[8].mxu1 }
 0x125   :  { %v906_v11 = vpop.f32.mrb[9].mxu0  ;;  %v1098_v12 = vpop.f32.mrb[9].mxu1  ;;  %v905_v5 = vadd.f32 %v2975_v59, %v2926_v9 }
 0x126   :  { %v2930_v13 = vpop.f32.mrb[10].mxu0  ;;  %v2932_v14 = vpop.f32.mrb[10].mxu1  ;;  %v892_v12 = vadd.f32 %v2975_v59, %v2918_v61 }
 0x127   :  { %v909_v15 = vpop.f32.mrb[11].mxu0  ;;  %v1101_v16 = vpop.f32.mrb[11].mxu1 }
 0x12c   :  { %v912_v17 = vpop.f32.mrb[12].mxu0  ;;  %v2934_v18 = vpop.f32.mrb[12].mxu1 }
 0x12d   :  { %v914_v19 = vpop.f32.mrb[13].mxu0  ;;  %v1106_v20 = vpop.f32.mrb[13].mxu1 }
 0x12e   :  { %v2936_v21 = vpop.f32.mrb[14].mxu0  ;;  %v2938_v22 = vpop.f32.mrb[14].mxu1 }
 0x12f   :  { %v917_v23 = vpop.f32.mrb[15].mxu0  ;;  %v1109_v24 = vpop.f32.mrb[15].mxu1 }
 0x134   :  { %v2940_v25 = vpop.f32.mrb[16].mxu0  ;;  %v2942_v26 = vpop.f32.mrb[16].mxu1 }
 0x135   :  { %v922_v27 = vpop.f32.mrb[17].mxu0  ;;  %v1114_v28 = vpop.f32.mrb[17].mxu1 }
 0x136   :  { %v2944_v29 = vpop.f32.mrb[18].mxu0  ;;  %v2946_v30 = vpop.f32.mrb[18].mxu1  ;;  %v913_v28 = vadd.f32 %v2975_v59, %v912_v17  ;;  %v908_v17 = vadd.f32 %v2975_v59, %v2930_v13 }
 0x137   :  { %v925_v31 = vpop.f32.mrb[19].mxu0  ;;  %v1117_v32 = vpop.f32.mrb[19].mxu1 }
 0x138   :  { %v916_v32 = vadd.f32 %v2975_v59, %v2936_v21  ;;  %v921_v21 = vadd.f32 %v2975_v59, %v2940_v25 }
 0x13c   :  { %v2948_v33 = vpop.f32.mrb[20].mxu0  ;;  %v2950_v34 = vpop.f32.mrb[20].mxu1 }
 0x13d   :  { %v930_v35 = vpop.f32.mrb[21].mxu0  ;;  %v1122_v36 = vpop.f32.mrb[21].mxu1 }
 0x13e   :  { %v2952_v37 = vpop.f32.mrb[22].mxu0  ;;  %v2954_v38 = vpop.f32.mrb[22].mxu1 }
 0x13f   :  { %v933_v39 = vpop.f32.mrb[23].mxu0  ;;  %v1125_v40 = vpop.f32.mrb[23].mxu1 }
 0x144   :  { %v2956_v41 = vpop.f32.mrb[24].mxu0  ;;  %v2958_v42 = vpop.f32.mrb[24].mxu1 }
 0x145   :  { %v938_v43 = vpop.f32.mrb[25].mxu0  ;;  %v1130_v44 = vpop.f32.mrb[25].mxu1 }
 0x146   :  { %v2960_v45 = vpop.f32.mrb[26].mxu0  ;;  %v2962_v46 = vpop.f32.mrb[26].mxu1 }
 0x147   :  { %v941_v47 = vpop.f32.mrb[27].mxu0  ;;  %v1133_v48 = vpop.f32.mrb[27].mxu1 }
 0x14c   :  { %v2964_v49 = vpop.f32.mrb[28].mxu0  ;;  %v2966_v50 = vpop.f32.mrb[28].mxu1 }
 0x14d   :  { %v946_v51 = vpop.f32.mrb[29].mxu0  ;;  %v1138_v52 = vpop.f32.mrb[29].mxu1 }
 0x14e   :  { %v2968_v53 = vpop.f32.mrb[30].mxu0  ;;  %v2970_v54 = vpop.f32.mrb[30].mxu1 }
 0x14f   :  { %v949_v55 = vpop.f32.mrb[31].mxu0  ;;  %v1141_v56 = vpop.f32.mrb[31].mxu1 }
 0x150   :  { %v929_v56 = vadd.f32 %v2975_v59, %v2948_v33  ;;  %v924_v33 = vadd.f32 %v2975_v59, %v2944_v29 }
 0x154   :  { %v2980_v0 = vpop.f32.mrb[32].mxu0  ;;  %v2254_v3 = vpop.f32.mrb[32].mxu1 }
 0x155   :  { %v1186_v7 = vadd.f32 %v2254_v3, %v897_v60  ;;  %v954_v8 = vpop.f32.mrb[33].mxu0  ;;  %v1177_v11 = vpop.f32.mrb[33].mxu1 }
 0x156   :  { %v1178_v15 = vadd.f32 %v1177_v11, %v889_v63  ;;  %v2985_v16 = vpop.f32.mrb[34].mxu0  ;;  %v2255_v19 = vpop.f32.mrb[34].mxu1  ;;  %v932_v63 = vadd.f32 %v2975_v59, %v2952_v37  ;;  %v937_v37 = vadd.f32 %v2975_v59, %v2956_v41 }
 0x157   :  { %v1189_v20 = vadd.f32 %v2255_v19, %v900_v4  ;;  %v957_v1 = vpop.f32.mrb[35].mxu0  ;;  %v1180_v23 = vpop.f32.mrb[35].mxu1 }
 0x158   :  { %v1181_v24 = vadd.f32 %v1180_v23, %v892_v12 }
 0x159   :  { %v2013_v57 = vpack.c.bf16 %v1189_v20, %v1186_v7 }
 0x15a   :  { %v2008_v27 = vpack.c.bf16 %v1181_v24, %v1178_v15  ;;  %v945_v24 = vadd.f32 %v2975_v59, %v2964_v49  ;;  %v940_v49 = vadd.f32 %v2975_v59, %v2960_v45 }
 0x15b   :  { %2165 = vst [vmem:[%s3193_s3 + $0x8] sm:$0xff] %v2013_v57  }
 0x15c   :  { %2009 = vst [vmem:[%s3193_s3] sm:$0xff] %v2008_v27   ;;  %v960_v61 = vpop.f32.mrb[36].mxu0  ;;  %v2258_v31 = vpop.f32.mrb[36].mxu1  ;;  %v948_v27 = vadd.f32 %v2975_v59, %v2968_v53  ;;  %v953_v53 = vadd.f32 %v2975_v59, %v2980_v0 }
 0x15d   :  { %v1202_v35 = vadd.f32 %v2258_v31, %v913_v28  ;;  %v962_v36 = vpop.f32.mrb[37].mxu0  ;;  %v1193_v39 = vpop.f32.mrb[37].mxu1 }
 0x15e   :  { %v1194_v40 = vadd.f32 %v1193_v39, %v905_v5  ;;  %v963_v43 = vpop.f32.mrb[38].mxu0  ;;  %v2259_v44 = vpop.f32.mrb[38].mxu1 }
 0x15f   :  { %v1205_v47 = vadd.f32 %v2259_v44, %v916_v32  ;;  %v965_v9 = vpop.f32.mrb[39].mxu0  ;;  %v1196_v48 = vpop.f32.mrb[39].mxu1 }
 0x160   :  { %v1197_v51 = vadd.f32 %v1196_v48, %v908_v17  ;;  %v961_v9 = vadd.f32 %v2975_v59, %v960_v61  ;;  %v956_v61 = vadd.f32 %v2975_v59, %v2985_v16 }
 0x161   :  { %v2023_v52 = vpack.c.bf16 %v1205_v47, %v1202_v35 }
 0x162   :  { %v2018_v55 = vpack.c.bf16 %v1197_v51, %v1194_v40  ;;  %v964_v51 = vadd.f32 %v2975_v59, %v963_v43 }
 0x163   :  { %2167 = vst [vmem:[%s3193_s3 + $0x18] sm:$0xff] %v2023_v52  }
 0x164   :  { %2166 = vst [vmem:[%s3193_s3 + $0x10] sm:$0xff] %v2018_v55   ;;  %v968_v13 = vpop.f32.mrb[40].mxu0  ;;  %v2262_v60 = vpop.f32.mrb[40].mxu1 }
 0x165   :  { %v1218_v3 = vadd.f32 %v2262_v60, %v929_v56  ;;  %v970_v4 = vpop.f32.mrb[41].mxu0  ;;  %v1209_v7 = vpop.f32.mrb[41].mxu1  ;;  %v969_v43 = vadd.f32 %v2975_v59, %v968_v13 }
 0x166   :  { %v1210_v8 = vadd.f32 %v1209_v7, %v921_v21  ;;  %v971_v11 = vpop.f32.mrb[42].mxu0  ;;  %v2263_v12 = vpop.f32.mrb[42].mxu1 }
 0x167   :  { %v1221_v15 = vadd.f32 %v2263_v12, %v932_v63  ;;  %v973_v25 = vpop.f32.mrb[43].mxu0  ;;  %v1212_v19 = vpop.f32.mrb[43].mxu1 }
 0x168   :  { %v1213_v20 = vadd.f32 %v1212_v19, %v924_v33 }
 0x169   :  { %v2033_v1 = vpack.c.bf16 %v1221_v15, %v1218_v3 }
 0x16a   :  { %v2028_v23 = vpack.c.bf16 %v1213_v20, %v1210_v8 }
 0x16b   :  { %2169 = vst [vmem:[%s3193_s3 + $0x28] sm:$0xff] %v2033_v1  }
 0x16c   :  { %2168 = vst [vmem:[%s3193_s3 + $0x20] sm:$0xff] %v2028_v23   ;;  %v976_v29 = vpop.f32.mrb[44].mxu0  ;;  %v2266_v57 = vpop.f32.mrb[44].mxu1  ;;  %v972_v23 = vadd.f32 %v2975_v59, %v971_v11 }
 0x16d   :  { %v1234_v28 = vadd.f32 %v2266_v57, %v945_v24  ;;  %v978_v5 = vpop.f32.mrb[45].mxu0  ;;  %v1225_v31 = vpop.f32.mrb[45].mxu1  ;;  %v977_v12 = vadd.f32 %v2975_v59, %v976_v29 }
 0x16e   :  { %v1226_v32 = vadd.f32 %v1225_v31, %v937_v37  ;;  %v979_v35 = vpop.f32.mrb[46].mxu0  ;;  %v2267_v36 = vpop.f32.mrb[46].mxu1 }
 0x16f   :  { %v1237_v39 = vadd.f32 %v2267_v36, %v948_v27  ;;  %v981_v41 = vpop.f32.mrb[47].mxu0  ;;  %v1228_v17 = vpop.f32.mrb[47].mxu1  ;;  %v980_v25 = vadd.f32 %v2975_v59, %v979_v35 }
 0x170   :  { %v1229_v40 = vadd.f32 %v1228_v17, %v940_v49 }
 0x171   :  { %v2043_v44 = vpack.c.bf16 %v1237_v39, %v1234_v28 }
 0x172   :  { %v2038_v47 = vpack.c.bf16 %v1229_v40, %v1226_v32 }
 0x173   :  { %2171 = vst [vmem:[%s3193_s3 + $0x38] sm:$0xff] %v2043_v44  }
 0x174   :  { %2170 = vst [vmem:[%s3193_s3 + $0x30] sm:$0xff] %v2038_v47   ;;  %v984_v45 = vpop.f32.mrb[48].mxu0  ;;  %v2270_v48 = vpop.f32.mrb[48].mxu1 }
 0x175   :  { %v1250_v52 = vadd.f32 %v2270_v48, %v961_v9  ;;  %v986_v55 = vpop.f32.mrb[49].mxu0  ;;  %v1241_v56 = vpop.f32.mrb[49].mxu1  ;;  %v985_v32 = vadd.f32 %v2975_v59, %v984_v45 }
 0x176   :  { %v1242_v21 = vadd.f32 %v1241_v56, %v953_v53  ;;  %v987_v60 = vpop.f32.mrb[50].mxu0  ;;  %v2271_v63 = vpop.f32.mrb[50].mxu1 }
 0x177   :  { %v1253_v3 = vadd.f32 %v2271_v63, %v964_v51  ;;  %v989_v4 = vpop.f32.mrb[51].mxu0  ;;  %v1244_v0 = vpop.f32.mrb[51].mxu1  ;;  %v988_v40 = vadd.f32 %v2975_v59, %v987_v60 }
 0x178   :  { %v1245_v7 = vadd.f32 %v1244_v0, %v956_v61 }
 0x179   :  { %v2053_v33 = vpack.c.bf16 %v1253_v3, %v1250_v52 }
 0x17a   :  { %v2048_v8 = vpack.c.bf16 %v1245_v7, %v1242_v21 }
 0x17b   :  { %2173 = vst [vmem:[%s3193_s3 + $0x48] sm:$0xff] %v2053_v33  }
 0x17c   :  { %2172 = vst [vmem:[%s3193_s3 + $0x40] sm:$0xff] %v2048_v8   ;;  %v992_v16 = vpop.f32.mrb[52].mxu0  ;;  %v2274_v15 = vpop.f32.mrb[52].mxu1 }
 0x17d   :  { %v1266_v19 = vadd.f32 %v2274_v15, %v977_v12  ;;  %v994_v20 = vpop.f32.mrb[53].mxu0  ;;  %v1257_v1 = vpop.f32.mrb[53].mxu1  ;;  %v993_v49 = vadd.f32 %v2975_v59, %v992_v16 }
 0x17e   :  { %v1258_v24 = vadd.f32 %v1257_v1, %v969_v43  ;;  %v995_v37 = vpop.f32.mrb[54].mxu0  ;;  %v2275_v29 = vpop.f32.mrb[54].mxu1 }
 0x17f   :  { %v1269_v57 = vadd.f32 %v2275_v29, %v980_v25  ;;  %v997_v27 = vpop.f32.mrb[55].mxu0  ;;  %v1260_v28 = vpop.f32.mrb[55].mxu1  ;;  %v996_v36 = vadd.f32 %v2975_v59, %v995_v37 }
 0x180   :  { %v1261_v13 = vadd.f32 %v1260_v28, %v972_v23 }
 0x181   :  { %v2063_v5 = vpack.c.bf16 %v1269_v57, %v1266_v19 }
 0x182   :  { %v2058_v31 = vpack.c.bf16 %v1261_v13, %v1258_v24 }
 0x183   :  { %2175 = vst [vmem:[%s3193_s3 + $0x58] sm:$0xff] %v2063_v5  }
 0x184   :  { %2174 = vst [vmem:[%s3193_s3 + $0x50] sm:$0xff] %v2058_v31   ;;  %v1000_v11 = vpop.f32.mrb[56].mxu0  ;;  %v2278_v35 = vpop.f32.mrb[56].mxu1 }
 0x185   :  { %v1282_v39 = vadd.f32 %v2278_v35, %v993_v49  ;;  %v1002_v41 = vpop.f32.mrb[57].mxu0  ;;  %v1273_v17 = vpop.f32.mrb[57].mxu1  ;;  %v1001_v56 = vadd.f32 %v2975_v59, %v1000_v11 }
 0x186   :  { %v1274_v44 = vadd.f32 %v1273_v17, %v985_v32  ;;  %v1003_v47 = vpop.f32.mrb[58].mxu0  ;;  %v2279_v9 = vpop.f32.mrb[58].mxu1 }
 0x187   :  { %v1285_v53 = vadd.f32 %v2279_v9, %v996_v36  ;;  %v1005_v48 = vpop.f32.mrb[59].mxu0  ;;  %v1276_v51 = vpop.f32.mrb[59].mxu1  ;;  %v1004_v4 = vadd.f32 %v2975_v59, %v1003_v47 }
 0x188   :  { %v1277_v45 = vadd.f32 %v1276_v51, %v988_v40 }
 0x189   :  { %v2073_v52 = vpack.c.bf16 %v1285_v53, %v1282_v39 }
 0x18a   :  { %v2068_v55 = vpack.c.bf16 %v1277_v45, %v1274_v44 }
 0x18b   :  { %2177 = vst [vmem:[%s3193_s3 + $0x68] sm:$0xff] %v2073_v52  }
 0x18c   :  { %2176 = vst [vmem:[%s3193_s3 + $0x60] sm:$0xff] %v2068_v55   ;;  %v1008_v61 = vpop.f32.mrb[60].mxu0  ;;  %v2282_v21 = vpop.f32.mrb[60].mxu1 }
 0x18d   :  { %v1009_v60 = vadd.f32 %v2975_v59, %v1008_v61  ;;  %v1010_v63 = vpop.f32.mrb[61].mxu0  ;;  %v1289_v3 = vpop.f32.mrb[61].mxu1 }
 0x18e   :  { %v1290_v0 = vadd.f32 %v1289_v3, %v1001_v56  ;;  %v1011_v7 = vpop.f32.mrb[62].mxu0  ;;  %v2283_v33 = vpop.f32.mrb[62].mxu1 }
 0x18f   :  { %v1298_v8 = vadd.f32 %v2282_v21, %v1009_v60  ;;  %v1012_v12 = vadd.f32 %v2975_v59, %v1011_v7  ;;  %v1013_v43 = vpop.f32.mrb[63].mxu0  ;;  %v1292_v16 = vpop.f32.mrb[63].mxu1 }
 0x190   :  { %v1293_v15 = vadd.f32 %v1292_v16, %v1004_v4 }
 0x191   :  { %v1301_v25 = vadd.f32 %v2283_v33, %v1012_v12 }
 0x192   :  { %v2078_v19 = vpack.c.bf16 %v1293_v15, %v1290_v0 }
 0x193   :  { %v2083_v20 = vpack.c.bf16 %v1301_v25, %v1298_v8 }
 0x194   :  { %2178 = vst [vmem:[%s3193_s3 + $0x70] sm:$0xff] %v2078_v19   ;;  %v1016_v1 = vpop.f32.mrb[64].mxu0  ;;  %v2286_v23 = vpop.f32.mrb[64].mxu1 }
 0x195   :  { %2179 = vst [vmem:[%s3193_s3 + $0x78] sm:$0xff] %v2083_v20   ;;  %v1017_v24 = vadd.f32 %v2975_v59, %v1016_v1  ;;  %v1018_v37 = vpop.f32.mrb[65].mxu0  ;;  %v1305_v29 = vpop.f32.mrb[65].mxu1 }
 0x196   :  { %v1019_v57 = vpop.f32.mrb[66].mxu0  ;;  %v2287_v27 = vpop.f32.mrb[66].mxu1 }
 0x197   :  { %v1306_v28 = vadd.f32 %v1305_v29, %v1017_v24  ;;  %v1020_v13 = vadd.f32 %v2975_v59, %v1019_v57  ;;  %v1021_v5 = vpop.f32.mrb[67].mxu0  ;;  %v1308_v31 = vpop.f32.mrb[67].mxu1  ;;  %v1089_v29 = vadd.f32 %v2975_v59, %v2922_v2  ;;  %v1084_v2 = vadd.f32 %v2975_v59, %v2920_v62 }
 0x198   :  { %v1092_v5 = vadd.f32 %v2975_v59, %v2924_v6  ;;  %v1097_v62 = vadd.f32 %v2975_v59, %v2928_v10  ;;  %v1100_v10 = vadd.f32 %v2975_v59, %v2932_v14  ;;  %v1113_v14 = vadd.f32 %v2975_v59, %v2942_v26 }
 0x199   :  { %v1309_v49 = vadd.f32 %v1308_v31, %v1020_v13  ;;  %v1116_v26 = vadd.f32 %v2975_v59, %v2946_v30  ;;  %v1129_v30 = vadd.f32 %v2975_v59, %v2958_v42  ;;  %v1132_v42 = vadd.f32 %v2975_v59, %v2962_v46 }
 0x19b   :  { %v2088_v32 = vpack.c.bf16 %v1309_v49, %v1306_v28 }
 0x19c   :  { %v1024_v11 = vpop.f32.mrb[68].mxu0  ;;  %v2290_v35 = vpop.f32.mrb[68].mxu1 }
 0x19d   :  { %2180 = vst [vmem:[%s3193_s3 + $0x80] sm:$0xff] %v2088_v32   ;;  %v1025_v36 = vadd.f32 %v2975_v59, %v1024_v11  ;;  %v1026_v39 = vpop.f32.mrb[69].mxu0  ;;  %v1321_v41 = vpop.f32.mrb[69].mxu1 }
 0x19e   :  { %v1027_v17 = vpop.f32.mrb[70].mxu0  ;;  %v2291_v40 = vpop.f32.mrb[70].mxu1 }
 0x19f   :  { %v1314_v44 = vadd.f32 %v2286_v23, %v1025_v36  ;;  %v1028_v47 = vadd.f32 %v2975_v59, %v1027_v17  ;;  %v1029_v9 = vpop.f32.mrb[71].mxu0  ;;  %v1324_v53 = vpop.f32.mrb[71].mxu1 }
 0x1a1   :  { %v1317_v48 = vadd.f32 %v2287_v27, %v1028_v47  ;;  %v1081_v27 = vadd.f32 %v2975_v59, %v2916_v58 }
 0x1a3   :  { %v2093_v51 = vpack.c.bf16 %v1317_v48, %v1314_v44  ;;  %v1105_v48 = vadd.f32 %v2975_v59, %v2934_v18 }
 0x1a4   :  { %v1032_v45 = vpop.f32.mrb[72].mxu0  ;;  %v3083_v52 = vpop.f32.mrb[72].mxu1 }
 0x1a5   :  { %2181 = vst [vmem:[%s3193_s3 + $0x88] sm:$0xff] %v2093_v51   ;;  %v1033_v55 = vadd.f32 %v2975_v59, %v1032_v45  ;;  %v1034_v56 = vpop.f32.mrb[73].mxu0  ;;  %v1337_v61 = vpop.f32.mrb[73].mxu1 }
 0x1a6   :  { %v1035_v21 = vpop.f32.mrb[74].mxu0  ;;  %v3089_v60 = vpop.f32.mrb[74].mxu1  ;;  %v1108_v56 = vadd.f32 %v2975_v59, %v2938_v22 }
 0x1a7   :  { %v1322_v63 = vadd.f32 %v1321_v41, %v1033_v55  ;;  %v1036_v3 = vadd.f32 %v2975_v59, %v1035_v21  ;;  %v1037_v4 = vpop.f32.mrb[75].mxu0  ;;  %v1340_v0 = vpop.f32.mrb[75].mxu1 }
 0x1a9   :  { %v1325_v7 = vadd.f32 %v1324_v53, %v1036_v3 }
 0x1ab   :  { %v2098_v33 = vpack.c.bf16 %v1325_v7, %v1322_v63 }
 0x1ac   :  { %v1040_v8 = vpop.f32.mrb[76].mxu0  ;;  %v3092_v12 = vpop.f32.mrb[76].mxu1 }
 0x1ad   :  { %2182 = vst [vmem:[%s3193_s3 + $0x90] sm:$0xff] %v2098_v33   ;;  %v1041_v43 = vadd.f32 %v2975_v59, %v1040_v8  ;;  %v1042_v16 = vpop.f32.mrb[77].mxu0  ;;  %v3098_v15 = vpop.f32.mrb[77].mxu1 }
 0x1ae   :  { %v1043_v25 = vpop.f32.mrb[78].mxu0  ;;  %v3100_v19 = vpop.f32.mrb[78].mxu1 }
 0x1af   :  { %v1330_v20 = vadd.f32 %v2290_v35, %v1041_v43  ;;  %v1044_v1 = vadd.f32 %v2975_v59, %v1043_v25  ;;  %v1045_v23 = vpop.f32.mrb[79].mxu0  ;;  %v3103_v24 = vpop.f32.mrb[79].mxu1 }
 0x1b0   :  { %v1121_v23 = vadd.f32 %v2975_v59, %v2950_v34 }
 0x1b1   :  { %v1333_v37 = vadd.f32 %v2291_v40, %v1044_v1 }
 0x1b3   :  { %v2103_v57 = vpack.c.bf16 %v1333_v37, %v1330_v20 }
 0x1b4   :  { %v1048_v28 = vpop.f32.mrb[80].mxu0  ;;  %v2302_v13 = vpop.f32.mrb[80].mxu1 }
 0x1b5   :  { %2183 = vst [vmem:[%s3193_s3 + $0x98] sm:$0xff] %v2103_v57   ;;  %v1049_v31 = vadd.f32 %v2975_v59, %v1048_v28  ;;  %v1378_v49 = vadd.f32 %v2302_v13, %v1089_v29  ;;  %v1050_v32 = vpop.f32.mrb[81].mxu0  ;;  %v1369_v11 = vpop.f32.mrb[81].mxu1 }
 0x1b6   :  { %v1370_v35 = vadd.f32 %v1369_v11, %v1081_v27  ;;  %v1051_v36 = vpop.f32.mrb[82].mxu0  ;;  %v2303_v58 = vpop.f32.mrb[82].mxu1 }
 0x1b7   :  { %v1338_v39 = vadd.f32 %v1337_v61, %v1049_v31  ;;  %v1052_v41 = vadd.f32 %v2975_v59, %v1051_v36  ;;  %v1381_v17 = vadd.f32 %v2303_v58, %v1092_v5  ;;  %v1053_v6 = vpop.f32.mrb[83].mxu0  ;;  %v1372_v40 = vpop.f32.mrb[83].mxu1 }
 0x1b8   :  { %v1373_v44 = vadd.f32 %v1372_v40, %v1084_v2 }
 0x1b9   :  { %v1341_v47 = vadd.f32 %v1340_v0, %v1052_v41  ;;  %v2133_v9 = vpack.c.bf16 %v1381_v17, %v1378_v49  ;;  %v1137_v41 = vadd.f32 %v2975_v59, %v2966_v50 }
 0x1ba   :  { %v2128_v53 = vpack.c.bf16 %v1373_v44, %v1370_v35 }
 0x1bb   :  { %v2108_v51 = vpack.c.bf16 %v1341_v47, %v1338_v39  ;;  %2189 = vst [vmem:[%s3193_s3 + $0xc8] sm:$0xff] %v2133_v9  }
 0x1bc   :  { %2188 = vst [vmem:[%s3193_s3 + $0xc0] sm:$0xff] %v2128_v53   ;;  %v1056_v45 = vpop.f32.mrb[84].mxu0  ;;  %v2306_v55 = vpop.f32.mrb[84].mxu1 }
 0x1bd   :  { %2184 = vst [vmem:[%s3193_s3 + $0xa0] sm:$0xff] %v2108_v51   ;;  %v1057_v18 = vadd.f32 %v2975_v59, %v1056_v45  ;;  %v1394_v61 = vadd.f32 %v2306_v55, %v1105_v48  ;;  %v1058_v21 = vpop.f32.mrb[85].mxu0  ;;  %v1385_v63 = vpop.f32.mrb[85].mxu1 }
 0x1be   :  { %v1386_v3 = vadd.f32 %v1385_v63, %v1097_v62  ;;  %v1059_v4 = vpop.f32.mrb[86].mxu0  ;;  %v2307_v0 = vpop.f32.mrb[86].mxu1 }
 0x1bf   :  { %v1346_v7 = vadd.f32 %v3083_v52, %v1057_v18  ;;  %v1060_v33 = vadd.f32 %v2975_v59, %v1059_v4  ;;  %v1397_v22 = vadd.f32 %v2307_v0, %v1108_v56  ;;  %v1061_v8 = vpop.f32.mrb[87].mxu0  ;;  %v1388_v43 = vpop.f32.mrb[87].mxu1 }
 0x1c0   :  { %v1389_v16 = vadd.f32 %v1388_v43, %v1100_v10 }
 0x1c1   :  { %v1349_v25 = vadd.f32 %v3089_v60, %v1060_v33  ;;  %v2143_v20 = vpack.c.bf16 %v1397_v22, %v1394_v61  ;;  %v1124_v60 = vadd.f32 %v2975_v59, %v2954_v38 }
 0x1c2   :  { %v2138_v1 = vpack.c.bf16 %v1389_v16, %v1386_v3 }
 0x1c3   :  { %v2113_v37 = vpack.c.bf16 %v1349_v25, %v1346_v7  ;;  %2191 = vst [vmem:[%s3193_s3 + $0xd8] sm:$0xff] %v2143_v20  }
 0x1c4   :  { %2190 = vst [vmem:[%s3193_s3 + $0xd0] sm:$0xff] %v2138_v1   ;;  %v1064_v52 = vpop.f32.mrb[88].mxu0  ;;  %v2310_v29 = vpop.f32.mrb[88].mxu1 }
 0x1c5   :  { %2185 = vst [vmem:[%s3193_s3 + $0xa8] sm:$0xff] %v2113_v37   ;;  %v1065_v34 = vadd.f32 %v2975_v59, %v1064_v52  ;;  %v1410_v57 = vadd.f32 %v2310_v29, %v1121_v23  ;;  %v1066_v27 = vpop.f32.mrb[89].mxu0  ;;  %v1401_v28 = vpop.f32.mrb[89].mxu1 }
 0x1c6   :  { %v1402_v13 = vadd.f32 %v1401_v28, %v1113_v14  ;;  %v1067_v5 = vpop.f32.mrb[90].mxu0  ;;  %v2311_v31 = vpop.f32.mrb[90].mxu1 }
 0x1c7   :  { %v1354_v49 = vadd.f32 %v3098_v15, %v1065_v34  ;;  %v1068_v32 = vadd.f32 %v2975_v59, %v1067_v5  ;;  %v1413_v38 = vadd.f32 %v2311_v31, %v1124_v60  ;;  %v1069_v11 = vpop.f32.mrb[91].mxu0  ;;  %v1404_v2 = vpop.f32.mrb[91].mxu1 }
 0x1c8   :  { %v1405_v35 = vadd.f32 %v1404_v2, %v1116_v26 }
 0x1c9   :  { %v1357_v36 = vadd.f32 %v3103_v24, %v1068_v32  ;;  %v2153_v58 = vpack.c.bf16 %v1413_v38, %v1410_v57  ;;  %v1140_v24 = vadd.f32 %v2975_v59, %v2970_v54 }
 0x1ca   :  { %v2148_v39 = vpack.c.bf16 %v1405_v35, %v1402_v13 }
 0x1cb   :  { %v2118_v17 = vpack.c.bf16 %v1357_v36, %v1354_v49  ;;  %2193 = vst [vmem:[%s3193_s3 + $0xe8] sm:$0xff] %v2153_v58  }
 0x1cc   :  { %2192 = vst [vmem:[%s3193_s3 + $0xe0] sm:$0xff] %v2148_v39   ;;  %v1072_v15 = vpop.f32.mrb[92].mxu0  ;;  %v2314_v6 = vpop.f32.mrb[92].mxu1 }
 0x1cd   :  { %2186 = vst [vmem:[%s3193_s3 + $0xb0] sm:$0xff] %v2118_v17   ;;  %v1073_v50 = vadd.f32 %v2975_v59, %v1072_v15  ;;  %v1426_v40 = vadd.f32 %v2314_v6, %v1137_v41  ;;  %v1074_v44 = vpop.f32.mrb[93].mxu0  ;;  %v1417_v47 = vpop.f32.mrb[93].mxu1 }
 0x1ce   :  { %v1418_v9 = vadd.f32 %v1417_v47, %v1129_v30  ;;  %v1075_v53 = vpop.f32.mrb[94].mxu0  ;;  %v2315_v48 = vpop.f32.mrb[94].mxu1 }
 0x1cf   :  { %v1362_v51 = vadd.f32 %v3092_v12, %v1073_v50  ;;  %v1076_v62 = vadd.f32 %v2975_v59, %v1075_v53  ;;  %v1429_v54 = vadd.f32 %v2315_v48, %v1140_v24  ;;  %v1077_v45 = vpop.f32.mrb[95].mxu0  ;;  %v1420_v55 = vpop.f32.mrb[95].mxu1 }
 0x1d0   :  { %v1421_v56 = vadd.f32 %v1420_v55, %v1132_v42 }
 0x1d1   :  { %v1365_v18 = vadd.f32 %v3100_v19, %v1076_v62  ;;  %v2163_v61 = vpack.c.bf16 %v1429_v54, %v1426_v40 }
 0x1d2   :  { %v2158_v21 = vpack.c.bf16 %v1421_v56, %v1418_v9 }
 0x1d3   :  { %v2123_v63 = vpack.c.bf16 %v1365_v18, %v1362_v51  ;;  %2195 = vst [vmem:[%s3193_s3 + $0xf8] sm:$0xff] %v2163_v61  }
 0x1d4   :  { %2194 = vst [vmem:[%s3193_s3 + $0xf0] sm:$0xff] %v2158_v21  }
 0x1d5   :  { %2187 = vst [vmem:[%s3193_s3 + $0xb8] sm:$0xff] %v2123_v63  }

// kernel: _lambda_.5
= control target key start
LH: loop header
LB: loop body
LE: loop exit
PB: predicated region body
PF: predicated region fallthrough
CT: control target
= control target key end

     0   :  { %s2275_s1 = inlined_call_operand.vmem [shape: bf16[1152,256], index: 1, kind: input, shape index: {}]   ;;  %s2276_s0 = inlined_call_operand.vmem [shape: bf16[32,1152], index: 0, kind: input, shape index: {}]   ;;  %s2277_s2 = inlined_call_operand.vmem [shape: f32[1,256], index: 2, kind: input, shape index: {}]   ;;  %s2278_s3 = inlined_call_operand.vmem [shape: f32[32,256], index: 3, kind: output, shape index: {}]  }
   0x1   :  { %v1499_v0 = vld [vmem:[%s2275_s1 + $0x4] ss:$8 sps:$4 sm:$0xff]   ;;  %v1503_v2 = vld [vmem:[%s2275_s1] ss:$8 sps:$4 sm:$0xff]   ;;  %v1505_v4 = vld [vmem:[%s2275_s1 + $0x14] ss:$8 sps:$4 sm:$0xff]  }
   0x2   :  { %v1501_v1 = vld [vmem:[%s2275_s1 + $0x204] ss:$8 sps:$4 sm:$0xff]   ;;  %1003 = vmatprep.subr.bf16.mxu1 %v1499_v0  ;;  %v1504_v3 = vld [vmem:[%s2275_s1 + $0x200] ss:$8 sps:$4 sm:$0xff]   ;;  %v1507_v5 = vld [vmem:[%s2275_s1 + $0x214] ss:$8 sps:$4 sm:$0xff]  }
   0x3   :  { %1109 = vmatprep.subr.bf16.mxu0 %v1501_v1  ;;  %1004 = vmatpush1.bf16.msra.mxu1 %v1503_v2  ;;  %v1509_v6 = vld [vmem:[%s2275_s1 + $0x10] ss:$8 sps:$4 sm:$0xff]   ;;  %v1511_v8 = vld [vmem:[%s2275_s1 + $0x24] ss:$8 sps:$4 sm:$0xff]   ;;  %v1515_v10 = vld [vmem:[%s2275_s1 + $0x20] ss:$8 sps:$4 sm:$0xff]  }
   0x4   :  { %1110 = vmatpush1.bf16.msra.mxu0 %v1504_v3  ;;  %1005 = vmatprep.subr.bf16.mxu1 %v1505_v4  ;;  %v1510_v7 = vld [vmem:[%s2275_s1 + $0x210] ss:$8 sps:$4 sm:$0xff]   ;;  %v1513_v9 = vld [vmem:[%s2275_s1 + $0x224] ss:$8 sps:$4 sm:$0xff]   ;;  %v1516_v11 = vld [vmem:[%s2275_s1 + $0x220] ss:$8 sps:$4 sm:$0xff]  }
   0x5   :  { %1111 = vmatprep.subr.bf16.mxu0 %v1507_v5  ;;  %v1517_v12 = vld [vmem:[%s2275_s1 + $0x34] ss:$8 sps:$4 sm:$0xff]   ;;  %v1521_v14 = vld [vmem:[%s2275_s1 + $0x30] ss:$8 sps:$4 sm:$0xff]   ;;  %v1523_v16 = vld [vmem:[%s2275_s1 + $0x44] ss:$8 sps:$4 sm:$0xff]  }
   0x6   :  { %v1519_v13 = vld [vmem:[%s2275_s1 + $0x234] ss:$8 sps:$4 sm:$0xff]   ;;  %v1522_v15 = vld [vmem:[%s2275_s1 + $0x230] ss:$8 sps:$4 sm:$0xff]   ;;  %v1525_v17 = vld [vmem:[%s2275_s1 + $0x244] ss:$8 sps:$4 sm:$0xff]  }
   0x7   :  { %1006 = vmatpush1.bf16.msra.mxu1 %v1509_v6  ;;  %v1527_v18 = vld [vmem:[%s2275_s1 + $0x40] ss:$8 sps:$4 sm:$0xff]   ;;  %v1529_v20 = vld [vmem:[%s2275_s1 + $0x54] ss:$8 sps:$4 sm:$0xff]   ;;  %v1533_v22 = vld [vmem:[%s2275_s1 + $0x50] ss:$8 sps:$4 sm:$0xff]  }
   0x8   :  { %1112 = vmatpush1.bf16.msra.mxu0 %v1510_v7  ;;  %1007 = vmatprep.subr.bf16.mxu1 %v1511_v8  ;;  %v1528_v19 = vld [vmem:[%s2275_s1 + $0x240] ss:$8 sps:$4 sm:$0xff]   ;;  %v1531_v21 = vld [vmem:[%s2275_s1 + $0x254] ss:$8 sps:$4 sm:$0xff]   ;;  %v1534_v23 = vld [vmem:[%s2275_s1 + $0x250] ss:$8 sps:$4 sm:$0xff]  }
   0x9   :  { %1113 = vmatprep.subr.bf16.mxu0 %v1513_v9  ;;  %v1535_v24 = vld [vmem:[%s2275_s1 + $0x64] ss:$8 sps:$4 sm:$0xff]   ;;  %v1539_v26 = vld [vmem:[%s2275_s1 + $0x60] ss:$8 sps:$4 sm:$0xff]   ;;  %v1541_v28 = vld [vmem:[%s2275_s1 + $0x74] ss:$8 sps:$4 sm:$0xff]  }
   0xa   :  { %v1537_v25 = vld [vmem:[%s2275_s1 + $0x264] ss:$8 sps:$4 sm:$0xff]   ;;  %v1540_v27 = vld [vmem:[%s2275_s1 + $0x260] ss:$8 sps:$4 sm:$0xff]   ;;  %v1543_v29 = vld [vmem:[%s2275_s1 + $0x274] ss:$8 sps:$4 sm:$0xff]  }
   0xb   :  { %1008 = vmatpush1.bf16.msra.mxu1 %v1515_v10  ;;  %v1545_v30 = vld [vmem:[%s2275_s1 + $0x70] ss:$8 sps:$4 sm:$0xff]   ;;  %v1547_v32 = vld [vmem:[%s2275_s1 + $0x84] ss:$8 sps:$4 sm:$0xff]   ;;  %v1551_v34 = vld [vmem:[%s2275_s1 + $0x80] ss:$8 sps:$4 sm:$0xff]  }
   0xc   :  { %1114 = vmatpush1.bf16.msra.mxu0 %v1516_v11  ;;  %1009 = vmatprep.subr.bf16.mxu1 %v1517_v12  ;;  %v1546_v31 = vld [vmem:[%s2275_s1 + $0x270] ss:$8 sps:$4 sm:$0xff]   ;;  %v1549_v33 = vld [vmem:[%s2275_s1 + $0x284] ss:$8 sps:$4 sm:$0xff]   ;;  %v1552_v35 = vld [vmem:[%s2275_s1 + $0x280] ss:$8 sps:$4 sm:$0xff]  }
   0xd   :  { %1115 = vmatprep.subr.bf16.mxu0 %v1519_v13  ;;  %v1553_v36 = vld [vmem:[%s2275_s1 + $0x94] ss:$8 sps:$4 sm:$0xff]   ;;  %v1557_v38 = vld [vmem:[%s2275_s1 + $0x90] ss:$8 sps:$4 sm:$0xff]   ;;  %v1559_v40 = vld [vmem:[%s2275_s1 + $0xa4] ss:$8 sps:$4 sm:$0xff]  }
   0xe   :  { %v1555_v37 = vld [vmem:[%s2275_s1 + $0x294] ss:$8 sps:$4 sm:$0xff]   ;;  %v1558_v39 = vld [vmem:[%s2275_s1 + $0x290] ss:$8 sps:$4 sm:$0xff]   ;;  %v1561_v41 = vld [vmem:[%s2275_s1 + $0x2a4] ss:$8 sps:$4 sm:$0xff]  }
   0xf   :  { %1010 = vmatpush1.bf16.msra.mxu1 %v1521_v14  ;;  %v1563_v42 = vld [vmem:[%s2275_s1 + $0xa0] ss:$8 sps:$4 sm:$0xff]   ;;  %v1565_v44 = vld [vmem:[%s2275_s1 + $0xb4] ss:$8 sps:$4 sm:$0xff]   ;;  %v1569_v46 = vld [vmem:[%s2275_s1 + $0xb0] ss:$8 sps:$4 sm:$0xff]  }
  0x10   :  { %1116 = vmatpush1.bf16.msra.mxu0 %v1522_v15  ;;  %1011 = vmatprep.subr.bf16.mxu1 %v1523_v16  ;;  %v1564_v43 = vld [vmem:[%s2275_s1 + $0x2a0] ss:$8 sps:$4 sm:$0xff]   ;;  %v1567_v45 = vld [vmem:[%s2275_s1 + $0x2b4] ss:$8 sps:$4 sm:$0xff]   ;;  %v1570_v47 = vld [vmem:[%s2275_s1 + $0x2b0] ss:$8 sps:$4 sm:$0xff]  }
  0x11   :  { %1117 = vmatprep.subr.bf16.mxu0 %v1525_v17  ;;  %v1597_v48 = vld [vmem:[%s2276_s0 + $0x4] ss:$36 sps:$4 sm:$0xff]   ;;  %v1603_v51 = vld [vmem:[%s2276_s0 + $0x14] ss:$36 sps:$4 sm:$0xff]  }
  0x12   :  { %v1571_v49 = vld [vmem:[%s2275_s1 + $0xc4] ss:$8 sps:$4 sm:$0xff]   ;;  %1035 = vmatprep.mubr.bf16.mxu1 %v1597_v48  ;;  %v1575_v52 = vld [vmem:[%s2275_s1 + $0xc0] ss:$8 sps:$4 sm:$0xff]   ;;  %v1577_v54 = vld [vmem:[%s2275_s1 + $0xd4] ss:$8 sps:$4 sm:$0xff]   ;;  %1141 = vmatprep.mubr.bf16.mxu0 %v1603_v51 }
  0x13   :  { %1012 = vmatpush1.bf16.msra.mxu1 %v1527_v18  ;;  %v1573_v50 = vld [vmem:[%s2275_s1 + $0x2c4] ss:$8 sps:$4 sm:$0xff]   ;;  %v1576_v53 = vld [vmem:[%s2275_s1 + $0x2c0] ss:$8 sps:$4 sm:$0xff]   ;;  %v1579_v55 = vld [vmem:[%s2275_s1 + $0x2d4] ss:$8 sps:$4 sm:$0xff]  }
  0x14   :  { %1118 = vmatpush1.bf16.msra.mxu0 %v1528_v19  ;;  %1013 = vmatprep.subr.bf16.mxu1 %v1529_v20  ;;  %v1581_v56 = vld [vmem:[%s2275_s1 + $0xd0] ss:$8 sps:$4 sm:$0xff]   ;;  %v1583_v58 = vld [vmem:[%s2275_s1 + $0xe4] ss:$8 sps:$4 sm:$0xff]   ;;  %v1587_v60 = vld [vmem:[%s2275_s1 + $0xe0] ss:$8 sps:$4 sm:$0xff]  }
  0x15   :  { %1119 = vmatprep.subr.bf16.mxu0 %v1531_v21  ;;  %v1582_v57 = vld [vmem:[%s2275_s1 + $0x2d0] ss:$8 sps:$4 sm:$0xff]   ;;  %v1585_v59 = vld [vmem:[%s2275_s1 + $0x2e4] ss:$8 sps:$4 sm:$0xff]   ;;  %v1588_v61 = vld [vmem:[%s2275_s1 + $0x2e0] ss:$8 sps:$4 sm:$0xff]  }
  0x16   :  { %v1589_v62 = vld [vmem:[%s2275_s1 + $0xf4] ss:$8 sps:$4 sm:$0xff]   ;;  %v1593_v0 = vld [vmem:[%s2275_s1 + $0xf0] ss:$8 sps:$4 sm:$0xff]   ;;  %v1600_v2 = vld [vmem:[%s2275_s1 + $0x104] ss:$8 sps:$4 sm:$0xff]  }
  0x17   :  { %1014 = vmatpush1.bf16.msra.mxu1 %v1533_v22  ;;  %v1591_v63 = vld [vmem:[%s2275_s1 + $0x2f4] ss:$8 sps:$4 sm:$0xff]   ;;  %v1594_v1 = vld [vmem:[%s2275_s1 + $0x2f0] ss:$8 sps:$4 sm:$0xff]   ;;  %v1606_v3 = vld [vmem:[%s2275_s1 + $0x304] ss:$8 sps:$4 sm:$0xff]  }
  0x18   :  { %1120 = vmatpush1.bf16.msra.mxu0 %v1534_v23  ;;  %1015 = vmatprep.subr.bf16.mxu1 %v1535_v24  ;;  %v1595_v4 = vld [vmem:[%s2276_s0] ss:$36 sps:$4 sm:$0xff]   ;;  %v1601_v6 = vld [vmem:[%s2276_s0 + $0x10] ss:$36 sps:$4 sm:$0xff]  }
  0x19   :  { %1121 = vmatprep.subr.bf16.mxu0 %v1537_v25  ;;  %v1598_v5 = vld [vmem:[%s2275_s1 + $0x100] ss:$8 sps:$4 sm:$0xff]   ;;  %v1609_v8 = vld [vmem:[%s2275_s1 + $0x114] ss:$8 sps:$4 sm:$0xff]   ;;  %v1607_v10 = vld [vmem:[%s2275_s1 + $0x110] ss:$8 sps:$4 sm:$0xff]  }
  0x1a   :  { %v1604_v7 = vld [vmem:[%s2275_s1 + $0x300] ss:$8 sps:$4 sm:$0xff]   ;;  %v1612_v9 = vld [vmem:[%s2275_s1 + $0x314] ss:$8 sps:$4 sm:$0xff]   ;;  %v1610_v11 = vld [vmem:[%s2275_s1 + $0x310] ss:$8 sps:$4 sm:$0xff]  }
  0x1b   :  { %1016 = vmatpush1.bf16.msra.mxu1 %v1539_v26  ;;  %v1615_v12 = vld [vmem:[%s2275_s1 + $0x124] ss:$8 sps:$4 sm:$0xff]   ;;  %v1613_v14 = vld [vmem:[%s2275_s1 + $0x120] ss:$8 sps:$4 sm:$0xff]   ;;  %v1621_v16 = vld [vmem:[%s2275_s1 + $0x134] ss:$8 sps:$4 sm:$0xff]  }
  0x1c   :  { %1122 = vmatpush1.bf16.msra.mxu0 %v1540_v27  ;;  %1017 = vmatprep.subr.bf16.mxu1 %v1541_v28  ;;  %v1618_v13 = vld [vmem:[%s2275_s1 + $0x324] ss:$8 sps:$4 sm:$0xff]   ;;  %v1616_v15 = vld [vmem:[%s2275_s1 + $0x320] ss:$8 sps:$4 sm:$0xff]   ;;  %v1624_v17 = vld [vmem:[%s2275_s1 + $0x334] ss:$8 sps:$4 sm:$0xff]  }
  0x1d   :  { %1123 = vmatprep.subr.bf16.mxu0 %v1543_v29  ;;  %v1619_v18 = vld [vmem:[%s2275_s1 + $0x130] ss:$8 sps:$4 sm:$0xff]   ;;  %v1627_v20 = vld [vmem:[%s2275_s1 + $0x144] ss:$8 sps:$4 sm:$0xff]   ;;  %v1625_v22 = vld [vmem:[%s2275_s1 + $0x140] ss:$8 sps:$4 sm:$0xff]  }
  0x1e   :  { %v1622_v19 = vld [vmem:[%s2275_s1 + $0x330] ss:$8 sps:$4 sm:$0xff]   ;;  %v1630_v21 = vld [vmem:[%s2275_s1 + $0x344] ss:$8 sps:$4 sm:$0xff]   ;;  %v1628_v23 = vld [vmem:[%s2275_s1 + $0x340] ss:$8 sps:$4 sm:$0xff]  }
  0x1f   :  { %1018 = vmatpush1.bf16.msra.mxu1 %v1545_v30  ;;  %v1633_v24 = vld [vmem:[%s2275_s1 + $0x154] ss:$8 sps:$4 sm:$0xff]   ;;  %v1631_v26 = vld [vmem:[%s2275_s1 + $0x150] ss:$8 sps:$4 sm:$0xff]   ;;  %v1639_v28 = vld [vmem:[%s2275_s1 + $0x164] ss:$8 sps:$4 sm:$0xff]  }
  0x20   :  { %1124 = vmatpush1.bf16.msra.mxu0 %v1546_v31  ;;  %1019 = vmatprep.subr.bf16.mxu1 %v1547_v32  ;;  %v1636_v25 = vld [vmem:[%s2275_s1 + $0x354] ss:$8 sps:$4 sm:$0xff]   ;;  %v1634_v27 = vld [vmem:[%s2275_s1 + $0x350] ss:$8 sps:$4 sm:$0xff]   ;;  %v1689_v31 = vld [vmem:[%s2276_s0 + $0x48] ss:$36 sps:$4 sm:$0xff]  }
  0x21   :  { %1125 = vmatprep.subr.bf16.mxu0 %v1549_v33  ;;  %v1685_v29 = vld [vmem:[%s2276_s0 + $0x4c] ss:$36 sps:$4 sm:$0xff]   ;;  %v1687_v30 = vld [vmem:[%s2276_s0 + $0x5c] ss:$36 sps:$4 sm:$0xff]  }
  0x22   :  { %v1642_v32 = vld [vmem:[%s2275_s1 + $0x364] ss:$8 sps:$4 sm:$0xff]   ;;  %v1693_v33 = vld [vmem:[%s2276_s0 + $0x58] ss:$36 sps:$4 sm:$0xff]  }
  0x23   :  { %1020 = vmatpush1.bf16.msra.mxu1 %v1551_v34  ;;  %v1637_v34 = vld [vmem:[%s2275_s1 + $0x160] ss:$8 sps:$4 sm:$0xff]   ;;  %v1655_v48 = vld [vmem:[%s2275_s1 + $0x190] ss:$8 sps:$4 sm:$0xff]   ;;  %v1666_v51 = vld [vmem:[%s2275_s1 + $0x3a4] ss:$8 sps:$4 sm:$0xff]  }
  0x24   :  { %1126 = vmatpush1.bf16.msra.mxu0 %v1552_v35  ;;  %1021 = vmatprep.subr.bf16.mxu1 %v1553_v36  ;;  %v1640_v35 = vld [vmem:[%s2275_s1 + $0x360] ss:$8 sps:$4 sm:$0xff]   ;;  %v1645_v36 = vld [vmem:[%s2275_s1 + $0x174] ss:$8 sps:$4 sm:$0xff]  }
  0x25   :  { %1127 = vmatprep.subr.bf16.mxu0 %v1555_v37  ;;  %v1648_v37 = vld [vmem:[%s2275_s1 + $0x374] ss:$8 sps:$4 sm:$0xff]  }
  0x27   :  { %1022 = vmatpush1.bf16.msra.mxu1 %v1557_v38  ;;  %v1643_v38 = vld [vmem:[%s2275_s1 + $0x170] ss:$8 sps:$4 sm:$0xff]  }
  0x28   :  { %1128 = vmatpush1.bf16.msra.mxu0 %v1558_v39  ;;  %1023 = vmatprep.subr.bf16.mxu1 %v1559_v40  ;;  %v1646_v39 = vld [vmem:[%s2275_s1 + $0x370] ss:$8 sps:$4 sm:$0xff]   ;;  %v1651_v40 = vld [vmem:[%s2275_s1 + $0x184] ss:$8 sps:$4 sm:$0xff]  }
  0x29   :  { %1129 = vmatprep.subr.bf16.mxu0 %v1561_v41  ;;  %v1705_v41 = vld [vmem:[%s2276_s0 + $0xc] ss:$36 sps:$4 sm:$0xff]  }
  0x2b   :  { %1024 = vmatpush1.bf16.msra.mxu1 %v1563_v42  ;;  %v1654_v42 = vld [vmem:[%s2275_s1 + $0x384] ss:$8 sps:$4 sm:$0xff]  }
  0x2c   :  { %1130 = vmatpush1.bf16.msra.mxu0 %v1564_v43  ;;  %1025 = vmatprep.subr.bf16.mxu1 %v1565_v44  ;;  %v1708_v43 = vld [vmem:[%s2276_s0 + $0x1c] ss:$36 sps:$4 sm:$0xff]  }
  0x2d   :  { %1131 = vmatprep.subr.bf16.mxu0 %v1567_v45  ;;  %v1649_v44 = vld [vmem:[%s2275_s1 + $0x180] ss:$8 sps:$4 sm:$0xff]  }
  0x2e   :  { %v1652_v45 = vld [vmem:[%s2275_s1 + $0x380] ss:$8 sps:$4 sm:$0xff]  }
  0x2f   :  { %1026 = vmatpush1.bf16.msra.mxu1 %v1569_v46  ;;  %v1657_v46 = vld [vmem:[%s2275_s1 + $0x194] ss:$8 sps:$4 sm:$0xff]  }
  0x30   :  { %1132 = vmatpush1.bf16.msra.mxu0 %v1570_v47  ;;  %1027 = vmatprep.subr.bf16.mxu1 %v1571_v49  ;;  %v1660_v47 = vld [vmem:[%s2275_s1 + $0x394] ss:$8 sps:$4 sm:$0xff]   ;;  %v1658_v49 = vld [vmem:[%s2275_s1 + $0x390] ss:$8 sps:$4 sm:$0xff]  }
  0x31   :  { %1133 = vmatprep.subr.bf16.mxu0 %v1573_v50  ;;  %v1663_v50 = vld [vmem:[%s2275_s1 + $0x1a4] ss:$8 sps:$4 sm:$0xff]  }
  0x33   :  { %1028 = vmatpush1.bf16.msra.mxu1 %v1575_v52  ;;  %v1661_v52 = vld [vmem:[%s2275_s1 + $0x1a0] ss:$8 sps:$4 sm:$0xff]  }
  0x34   :  { %1134 = vmatpush1.bf16.msra.mxu0 %v1576_v53  ;;  %1029 = vmatprep.subr.bf16.mxu1 %v1577_v54  ;;  %v1664_v53 = vld [vmem:[%s2275_s1 + $0x3a0] ss:$8 sps:$4 sm:$0xff]   ;;  %v1669_v54 = vld [vmem:[%s2275_s1 + $0x1b4] ss:$8 sps:$4 sm:$0xff]  }
  0x35   :  { %1135 = vmatprep.subr.bf16.mxu0 %v1579_v55  ;;  %v1672_v55 = vld [vmem:[%s2275_s1 + $0x3b4] ss:$8 sps:$4 sm:$0xff]  }
  0x37   :  { %1030 = vmatpush1.bf16.msra.mxu1 %v1581_v56  ;;  %v1667_v56 = vld [vmem:[%s2275_s1 + $0x1b0] ss:$8 sps:$4 sm:$0xff]  }
  0x38   :  { %1136 = vmatpush1.bf16.msra.mxu0 %v1582_v57  ;;  %1031 = vmatprep.subr.bf16.mxu1 %v1583_v58  ;;  %v1670_v57 = vld [vmem:[%s2275_s1 + $0x3b0] ss:$8 sps:$4 sm:$0xff]   ;;  %v1675_v58 = vld [vmem:[%s2275_s1 + $0x1c4] ss:$8 sps:$4 sm:$0xff]  }
  0x39   :  { %1137 = vmatprep.subr.bf16.mxu0 %v1585_v59  ;;  %v1678_v59 = vld [vmem:[%s2275_s1 + $0x3c4] ss:$8 sps:$4 sm:$0xff]  }
  0x3b   :  { %1032 = vmatpush1.bf16.msra.mxu1 %v1587_v60  ;;  %v1673_v60 = vld [vmem:[%s2275_s1 + $0x1c0] ss:$8 sps:$4 sm:$0xff]  }
  0x3c   :  { %1138 = vmatpush1.bf16.msra.mxu0 %v1588_v61  ;;  %1033 = vmatprep.subr.bf16.mxu1 %v1589_v62  ;;  %v1676_v61 = vld [vmem:[%s2275_s1 + $0x3c0] ss:$8 sps:$4 sm:$0xff]   ;;  %v1681_v62 = vld [vmem:[%s2275_s1 + $0x1d4] ss:$8 sps:$4 sm:$0xff]  }
  0x3d   :  { %1139 = vmatprep.subr.bf16.mxu0 %v1591_v63  ;;  %v1684_v63 = vld [vmem:[%s2275_s1 + $0x3d4] ss:$8 sps:$4 sm:$0xff]  }
  0x3f   :  { %1034 = vmatpush1.bf16.msra.mxu1 %v1593_v0  ;;  %v1679_v0 = vld [vmem:[%s2275_s1 + $0x1d0] ss:$8 sps:$4 sm:$0xff]  }
  0x40   :  { %1140 = vmatpush1.bf16.msra.mxu0 %v1594_v1  ;;  %1056 = vmatprep.subr.bf16.mxu1 %v1600_v2  ;;  %v1682_v1 = vld [vmem:[%s2275_s1 + $0x3d0] ss:$8 sps:$4 sm:$0xff]   ;;  %v1692_v2 = vld [vmem:[%s2275_s1 + $0x1e4] ss:$8 sps:$4 sm:$0xff]  }
  0x41   :  { %1162 = vmatprep.subr.bf16.mxu0 %v1606_v3  ;;  %v1696_v3 = vld [vmem:[%s2275_s1 + $0x3e4] ss:$8 sps:$4 sm:$0xff]  }
  0x42   :  { %1036 = vmatmul.mubr.bf16.vlgmr.msra.gmra.mrb[0].mxu1 %v1595_v4  ;;  %v1690_v4 = vld [vmem:[%s2275_s1 + $0x1e0] ss:$8 sps:$4 sm:$0xff]  }
  0x43   :  { %1142 = vmatmul.mubr.bf16.vlgmr.msra.gmra.mrb[0].mxu0 %v1601_v6  ;;  %1057 = vmatpush1.bf16.msra.mxu1 %v1598_v5  ;;  %v1694_v5 = vld [vmem:[%s2275_s1 + $0x3e0] ss:$8 sps:$4 sm:$0xff]   ;;  %v1699_v6 = vld [vmem:[%s2275_s1 + $0x1f4] ss:$8 sps:$4 sm:$0xff]  }
  0x44   :  { %1163 = vmatpush1.bf16.msra.mxu0 %v1604_v7  ;;  %1058 = vmatprep.subr.bf16.mxu1 %v1609_v8  ;;  %v1702_v7 = vld [vmem:[%s2275_s1 + $0x3f4] ss:$8 sps:$4 sm:$0xff]   ;;  %v1697_v8 = vld [vmem:[%s2275_s1 + $0x1f0] ss:$8 sps:$4 sm:$0xff]  }
  0x45   :  { %1164 = vmatprep.subr.bf16.mxu0 %v1612_v9  ;;  %1045 = vmatprep.mubr.bf16.mxu1 %v1685_v29  ;;  %v1700_v9 = vld [vmem:[%s2275_s1 + $0x3f0] ss:$8 sps:$4 sm:$0xff]   ;;  %v1735_v29 = vld [vmem:[%s2275_s1 + $0x464] ss:$8 sps:$4 sm:$0xff]  }
  0x46   :  { %1151 = vmatprep.mubr.bf16.mxu0 %v1687_v30  ;;  %v1733_v30 = vld [vmem:[%s2275_s1 + $0x460] ss:$8 sps:$4 sm:$0xff]  }
  0x47   :  { %1059 = vmatpush1.bf16.msra.mxu1 %v1607_v10  ;;  %v1711_v10 = vld [vmem:[%s2275_s1 + $0x404] ss:$8 sps:$4 sm:$0xff]  }
  0x48   :  { %1165 = vmatpush1.bf16.msra.mxu0 %v1610_v11  ;;  %1060 = vmatprep.subr.bf16.mxu1 %v1615_v12  ;;  %v1703_v11 = vld [vmem:[%s2276_s0 + $0x8] ss:$36 sps:$4 sm:$0xff]   ;;  %v1706_v12 = vld [vmem:[%s2276_s0 + $0x18] ss:$36 sps:$4 sm:$0xff]  }
  0x49   :  { %1166 = vmatprep.subr.bf16.mxu0 %v1618_v13  ;;  %v1709_v13 = vld [vmem:[%s2275_s1 + $0x400] ss:$8 sps:$4 sm:$0xff]  }
  0x4a   :  { %1046 = vmatmul.mubr.bf16.gmra.mrb[4].mxu1 %v1689_v31  ;;  %v1738_v31 = vld [vmem:[%s2275_s1 + $0x474] ss:$8 sps:$4 sm:$0xff]  }
  0x4b   :  { %1061 = vmatpush1.bf16.msra.mxu1 %v1613_v14  ;;  %1152 = vmatmul.mubr.bf16.gmra.mrb[4].mxu0 %v1693_v33  ;;  %v1714_v14 = vld [vmem:[%s2275_s1 + $0x414] ss:$8 sps:$4 sm:$0xff]   ;;  %v1739_v33 = vld [vmem:[%s2276_s0 + $0x20] ss:$36 sps:$4 sm:$0xff]  }
  0x4c   :  { %1167 = vmatpush1.bf16.msra.mxu0 %v1616_v15  ;;  %1062 = vmatprep.subr.bf16.mxu1 %v1621_v16  ;;  %v1715_v15 = vld [vmem:[%s2276_s0 + $0x54] ss:$36 sps:$4 sm:$0xff]   ;;  %v1717_v16 = vld [vmem:[%s2276_s0 + $0x64] ss:$36 sps:$4 sm:$0xff]  }
  0x4d   :  { %1168 = vmatprep.subr.bf16.mxu0 %v1624_v17  ;;  %1088 = vmatprep.mubr.bf16.mxu1 %v1705_v41  ;;  %v1712_v17 = vld [vmem:[%s2275_s1 + $0x410] ss:$8 sps:$4 sm:$0xff]  }
  0x4e   :  { %1194 = vmatprep.mubr.bf16.mxu0 %v1708_v43 }
  0x4f   :  { %1063 = vmatpush1.bf16.msra.mxu1 %v1619_v18  ;;  %v1723_v18 = vld [vmem:[%s2275_s1 + $0x424] ss:$8 sps:$4 sm:$0xff]  }
  0x50   :  { %1169 = vmatpush1.bf16.msra.mxu0 %v1622_v19  ;;  %1064 = vmatprep.subr.bf16.mxu1 %v1627_v20  ;;  %v1719_v19 = vld [vmem:[%s2276_s0 + $0x50] ss:$36 sps:$4 sm:$0xff]   ;;  %v1720_v20 = vld [vmem:[%s2276_s0 + $0x60] ss:$36 sps:$4 sm:$0xff]  }
  0x51   :  { %1170 = vmatprep.subr.bf16.mxu0 %v1630_v21  ;;  %v1721_v21 = vld [vmem:[%s2275_s1 + $0x420] ss:$8 sps:$4 sm:$0xff]  }
  0x53   :  { %1065 = vmatpush1.bf16.msra.mxu1 %v1625_v22  ;;  %v1726_v22 = vld [vmem:[%s2275_s1 + $0x434] ss:$8 sps:$4 sm:$0xff]  }
  0x54   :  { %1171 = vmatpush1.bf16.msra.mxu0 %v1628_v23  ;;  %1066 = vmatprep.subr.bf16.mxu1 %v1633_v24  ;;  %v1724_v23 = vld [vmem:[%s2275_s1 + $0x430] ss:$8 sps:$4 sm:$0xff]   ;;  %v1729_v24 = vld [vmem:[%s2275_s1 + $0x444] ss:$8 sps:$4 sm:$0xff]  }
  0x55   :  { %1172 = vmatprep.subr.bf16.mxu0 %v1636_v25  ;;  %v1741_v25 = vmov 0  }
  0x57   :  { %1067 = vmatpush1.bf16.msra.mxu1 %v1631_v26  ;;  %v1727_v26 = vld [vmem:[%s2275_s1 + $0x440] ss:$8 sps:$4 sm:$0xff]  }
  0x58   :  { %1173 = vmatpush1.bf16.msra.mxu0 %v1634_v27  ;;  %1068 = vmatprep.subr.bf16.mxu1 %v1639_v28  ;;  %v1732_v27 = vld [vmem:[%s2275_s1 + $0x454] ss:$8 sps:$4 sm:$0xff]   ;;  %v1730_v28 = vld [vmem:[%s2275_s1 + $0x450] ss:$8 sps:$4 sm:$0xff]  }
  0x59   :  { %1174 = vmatprep.subr.bf16.mxu0 %v1642_v32  ;;  %v1736_v32 = vld [vmem:[%s2275_s1 + $0x470] ss:$8 sps:$4 sm:$0xff]  }
  0x5b   :  { %1069 = vmatpush1.bf16.msra.mxu1 %v1637_v34  ;;  %v1740_v34 = vld [vmem:[%s2276_s0 + $0x68] ss:$36 sps:$4 sm:$0xff]  }
  0x5c   :  { %1175 = vmatpush1.bf16.msra.mxu0 %v1640_v35  ;;  %1070 = vmatprep.subr.bf16.mxu1 %v1645_v36  ;;  %v181_v35 = vlaneseq }
  0x5d   :  { %1176 = vmatprep.subr.bf16.mxu0 %v1648_v37 }
  0x5e   :  { %v182_v36 = vshrl.u32 %v181_v35, 7 }
  0x5f   :  { %1071 = vmatpush1.bf16.msra.mxu1 %v1643_v38 }
  0x60   :  { %1177 = vmatpush1.bf16.msra.mxu0 %v1646_v39  ;;  %1072 = vmatprep.subr.bf16.mxu1 %v1651_v40  ;;  %v183_v40 = vsub.s32 0, %v182_v36  ;;  %v187_v43 = vsub.s32 1, %v182_v36 }
  0x61   :  { %1178 = vmatprep.subr.bf16.mxu0 %v1654_v42  ;;  %v179_v42 = vld [vmem:[%s2277_s2] sm:$0x3] }
  0x63   :  { %1073 = vmatpush1.bf16.msra.mxu1 %v1649_v44  ;;  %v184_v44 = vrot.slane %v179_v42, %v183_v40 }
  0x64   :  { %1179 = vmatpush1.bf16.msra.mxu0 %v1652_v45  ;;  %1074 = vmatprep.subr.bf16.mxu1 %v1657_v46  ;;  %v188_v45 = vrot.slane %v179_v42, %v187_v43 }
  0x65   :  { %1180 = vmatprep.subr.bf16.mxu0 %v1660_v47 }
  0x67   :  { %1075 = vmatpush1.bf16.msra.mxu1 %v1655_v48 }
  0x68   :  { %1181 = vmatpush1.bf16.msra.mxu0 %v1658_v49  ;;  %1076 = vmatprep.subr.bf16.mxu1 %v1663_v50 }
  0x69   :  { %1182 = vmatprep.subr.bf16.mxu0 %v1666_v51 }
  0x6b   :  { %1077 = vmatpush1.bf16.msra.mxu1 %v1661_v52 }
  0x6c   :  { %1183 = vmatpush1.bf16.msra.mxu0 %v1664_v53  ;;  %1078 = vmatprep.subr.bf16.mxu1 %v1669_v54 }
  0x6d   :  { %1184 = vmatprep.subr.bf16.mxu0 %v1672_v55 }
  0x6f   :  { %1079 = vmatpush1.bf16.msra.mxu1 %v1667_v56 }
  0x70   :  { %1185 = vmatpush1.bf16.msra.mxu0 %v1670_v57  ;;  %1080 = vmatprep.subr.bf16.mxu1 %v1675_v58 }
  0x71   :  { %1186 = vmatprep.subr.bf16.mxu0 %v1678_v59 }
  0x73   :  { %1081 = vmatpush1.bf16.msra.mxu1 %v1673_v60 }
  0x74   :  { %1187 = vmatpush1.bf16.msra.mxu0 %v1676_v61  ;;  %1082 = vmatprep.subr.bf16.mxu1 %v1681_v62 }
  0x75   :  { %1188 = vmatprep.subr.bf16.mxu0 %v1684_v63 }
  0x77   :  { %1083 = vmatpush1.bf16.msra.mxu1 %v1679_v0 }
  0x78   :  { %1189 = vmatpush1.bf16.msra.mxu0 %v1682_v1  ;;  %1084 = vmatprep.subr.bf16.mxu1 %v1692_v2 }
  0x79   :  { %1190 = vmatprep.subr.bf16.mxu0 %v1696_v3 }
  0x7b   :  { %1085 = vmatpush1.bf16.msra.mxu1 %v1690_v4 }
  0x7c   :  { %1191 = vmatpush1.bf16.msra.mxu0 %v1694_v5  ;;  %1086 = vmatprep.subr.bf16.mxu1 %v1699_v6 }
  0x7d   :  { %1192 = vmatprep.subr.bf16.mxu0 %v1702_v7 }
  0x7f   :  { %1087 = vmatpush1.bf16.msra.mxu1 %v1697_v8 }
  0x80   :  { %1193 = vmatpush1.bf16.msra.mxu0 %v1700_v9  ;;  %1442 = vmatprep.subr.bf16.mxu1 %v1711_v10 }
  0x81   :  { %1215 = vmatprep.subr.bf16.mxu0 %v1711_v10 }
  0x82   :  { %1089 = vmatmul.mubr.bf16.vlgmr.msra.gmra.mrb[0].mxu1 %v1703_v11 }
  0x83   :  { %1195 = vmatmul.mubr.bf16.vlgmr.msra.gmra.mrb[0].mxu0 %v1706_v12  ;;  %1450 = vmatpush1.bf16.msra.mxu1 %v1709_v13 }
  0x84   :  { %1216 = vmatpush1.bf16.msra.mxu0 %v1709_v13  ;;  %1443 = vmatprep.subr.bf16.mxu1 %v1714_v14 }
  0x85   :  { %1217 = vmatprep.subr.bf16.mxu0 %v1714_v14  ;;  %1098 = vmatprep.mubr.bf16.mxu1 %v1715_v15 }
  0x86   :  { %1204 = vmatprep.mubr.bf16.mxu0 %v1717_v16 }
  0x87   :  { %1451 = vmatpush1.bf16.msra.mxu1 %v1712_v17 }
  0x88   :  { %1218 = vmatpush1.bf16.msra.mxu0 %v1712_v17  ;;  %1444 = vmatprep.subr.bf16.mxu1 %v1723_v18 }
  0x89   :  { %1219 = vmatprep.subr.bf16.mxu0 %v1723_v18 }
  0x8a   :  { %1099 = vmatmul.mubr.bf16.gmra.mrb[4].mxu1 %v1719_v19 }
  0x8b   :  { %1205 = vmatmul.mubr.bf16.gmra.mrb[4].mxu0 %v1720_v20  ;;  %1452 = vmatpush1.bf16.msra.mxu1 %v1721_v21 }
  0x8c   :  { %1220 = vmatpush1.bf16.msra.mxu0 %v1721_v21  ;;  %1445 = vmatprep.subr.bf16.mxu1 %v1726_v22 }
  0x8d   :  { %1221 = vmatprep.subr.bf16.mxu0 %v1726_v22  ;;  %1247 = vmatprep.mubr.bf16.mxu0 %v1741_v25 }
  0x8e   :  { %1257 = vmatprep.mubr.bf16.mxu1 %v1741_v25 }
  0x8f   :  { %1453 = vmatpush1.bf16.msra.mxu1 %v1724_v23 }
  0x90   :  { %1222 = vmatpush1.bf16.msra.mxu0 %v1724_v23  ;;  %1446 = vmatprep.subr.bf16.mxu1 %v1729_v24 }
  0x91   :  { %1223 = vmatprep.subr.bf16.mxu0 %v1729_v24 }
  0x93   :  { %1454 = vmatpush1.bf16.msra.mxu1 %v1727_v26 }
  0x94   :  { %1224 = vmatpush1.bf16.msra.mxu0 %v1727_v26  ;;  %1447 = vmatprep.subr.bf16.mxu1 %v1732_v27 }
  0x95   :  { %1225 = vmatprep.subr.bf16.mxu0 %v1732_v27 }
  0x97   :  { %1455 = vmatpush1.bf16.msra.mxu1 %v1730_v28 }
  0x98   :  { %1226 = vmatpush1.bf16.msra.mxu0 %v1730_v28  ;;  %1448 = vmatprep.subr.bf16.mxu1 %v1735_v29 }
  0x99   :  { %1227 = vmatprep.subr.bf16.mxu0 %v1735_v29 }
  0x9b   :  { %1456 = vmatpush1.bf16.msra.mxu1 %v1733_v30 }
  0x9c   :  { %1228 = vmatpush1.bf16.msra.mxu0 %v1733_v30  ;;  %1449 = vmatprep.subr.bf16.mxu1 %v1738_v31 }
  0x9d   :  { %1229 = vmatprep.subr.bf16.mxu0 %v1738_v31 }
  0x9f   :  { %1457 = vmatpush1.bf16.msra.mxu1 %v1736_v32 }
  0xa0   :  { %1230 = vmatpush1.bf16.msra.mxu0 %v1736_v32 }
  0xa2   :  { %1258 = vmatmul.mubr.bf16.vlgmr.msra.gmra.mrb[8].mxu1 %v1740_v34 }
  0xa3   :  { %1248 = vmatmul.mubr.bf16.vlgmr.msra.gmra.mrb[0].mxu0 %v1739_v33 }
 0x155   :  { %v1090_v37 = vpop.f32.mrb[0].mxu1 }
 0x156   :  { %v1092_v38 = vpop.f32.mrb[1].mxu1  ;;  %v1458_v62 = vadd.f32 %v1090_v37, %v184_v44 }
 0x157   :  { %v1094_v39 = vpop.f32.mrb[2].mxu1  ;;  %v1460_v63 = vadd.f32 %v1092_v38, %v188_v45 }
 0x158   :  { %v1096_v41 = vpop.f32.mrb[3].mxu1  ;;  %v1462_v2 = vadd.f32 %v1094_v39, %v184_v44 }
 0x159   :  { %v1464_v7 = vadd.f32 %v1096_v41, %v188_v45 }
 0x15d   :  { %v1100_v46 = vpop.f32.mrb[4].mxu1 }
 0x15e   :  { %v1206_v47 = vpop.f32.mrb[4].mxu0  ;;  %v1466_v48 = vadd.f32 %v1100_v46, %v184_v44  ;;  %v1102_v49 = vpop.f32.mrb[5].mxu1 }
 0x15f   :  { %v1208_v50 = vpop.f32.mrb[5].mxu0  ;;  %v1469_v51 = vadd.f32 %v1102_v49, %v188_v45  ;;  %v1104_v52 = vpop.f32.mrb[6].mxu1 }
 0x160   :  { %v1210_v53 = vpop.f32.mrb[6].mxu0  ;;  %v1467_v54 = vadd.f32 %v1466_v48, %v1206_v47  ;;  %v1472_v55 = vadd.f32 %v1104_v52, %v184_v44  ;;  %v1106_v56 = vpop.f32.mrb[7].mxu1 }
 0x161   :  { %v1212_v57 = vpop.f32.mrb[7].mxu0  ;;  %v1470_v58 = vadd.f32 %v1469_v51, %v1208_v50  ;;  %v1475_v59 = vadd.f32 %v1106_v56, %v188_v45 }
 0x162   :  { %v1473_v60 = vadd.f32 %v1472_v55, %v1210_v53 }
 0x163   :  { %v1476_v61 = vadd.f32 %v1475_v59, %v1212_v57 }
 0x175   :  { %v1259_v1 = vpop.f32.mrb[8].mxu1 }
 0x176   :  { %v1249_v0 = vpop.f32.mrb[0].mxu0  ;;  %v1468_v4 = vadd.f32 %v1467_v54, %v1259_v1  ;;  %v1261_v6 = vpop.f32.mrb[9].mxu1 }
 0x177   :  { %v1459_v3 = vadd.f32 %v1458_v62, %v1249_v0  ;;  %v1251_v5 = vpop.f32.mrb[1].mxu0  ;;  %v1471_v9 = vadd.f32 %v1470_v58, %v1261_v6  ;;  %v1263_v11 = vpop.f32.mrb[10].mxu1 }
 0x178   :  { %v1461_v8 = vadd.f32 %v1460_v63, %v1251_v5  ;;  %v1253_v10 = vpop.f32.mrb[2].mxu0  ;;  %1272 = vst [vmem:[%s2278_s3 + $0x20] sm:$0xff] %v1468_v4  ;;  %v1474_v13 = vadd.f32 %v1473_v60, %v1263_v11  ;;  %v1265_v15 = vpop.f32.mrb[11].mxu1 }
 0x179   :  { %1268 = vst [vmem:[%s2278_s3] sm:$0xff] %v1459_v3  ;;  %v1463_v12 = vadd.f32 %v1462_v2, %v1253_v10  ;;  %v1255_v14 = vpop.f32.mrb[3].mxu0  ;;  %1273 = vst [vmem:[%s2278_s3 + $0x28] sm:$0xff] %v1471_v9  ;;  %v1477_v17 = vadd.f32 %v1476_v61, %v1265_v15 }
 0x17a   :  { %1269 = vst [vmem:[%s2278_s3 + $0x8] sm:$0xff] %v1461_v8  ;;  %v1465_v16 = vadd.f32 %v1464_v7, %v1255_v14  ;;  %1274 = vst [vmem:[%s2278_s3 + $0x30] sm:$0xff] %v1474_v13 }
 0x17b   :  { %1270 = vst [vmem:[%s2278_s3 + $0x10] sm:$0xff] %v1463_v12  ;;  %1275 = vst [vmem:[%s2278_s3 + $0x38] sm:$0xff] %v1477_v17 }
 0x17c   :  { %1271 = vst [vmem:[%s2278_s3 + $0x18] sm:$0xff] %v1465_v16 }

</bundles_post_ra>
